<compile_context>
chip_gen: v7x
topology: tpu7x:2x2x1
jax: 0.10.0
libtpu: 0.0.40
codegen_flags: <defaults>
</compile_context>

<pallas_src>
import jax
import jax.numpy as jnp
from jax import lax
from jax.experimental import pallas as pl
from jax.experimental.pallas import tpu as pltpu


TIME_CHUNK = 32   # time steps whose layer-1 input projection is hoisted at once


def _round_up(x, m):
    return (x + m - 1) // m * m


def _pick_batch_tiling(B):
    """Sublane-aligned batch tile.

    * >= 2 grid blocks whenever B allows, so both v7x TensorCores get work
      (the grid axis is marked "parallel").
    * tile cap 256 on the 256x256 MXUs (v6e/v7x: 256-row LHS is still one
      MXU pass per recurrence step), 128 elsewhere (v5e MXU is 128 wide).
    """
    B8 = _round_up(B, 8)
    cap = 128
    try:
        kind = jax.devices()[0].device_kind.lower()
        if ("v6" in kind) or ("v7" in kind):
            cap = 256
    except Exception:
        pass
    if B8 >= 16:
        b_tile = min(cap, _round_up(-(-B8 // 2), 8))
    else:
        b_tile = B8
    return b_tile, _round_up(B8, b_tile)


def eeg_lstm_kernel(x_ref,                       # (T, Bt, C)
                    w_ih1_ref, b1_ref,           # (C, 4H), (1, 4H)
                    w_rec_ref, b2_ref,           # (2H, 8H), (1, 4H)
                    w_fc1_ref, b_fc1_ref,        # (H, FC1), (1, FC1)
                    w_fc2_ref, b_fc2_ref,        # (FC1, NCLS), (1, NCLS)
                    o_ref,                       # (Bt, NCLS)
                    gates1_ref):                 # (Tc, Bt, 4H) scratch
    T, Bt, C = x_ref.shape
    Tc = gates1_ref.shape[0]
    H = w_rec_ref.shape[1] // 8
    H4 = 4 * H
    n_chunks = -(-T // Tc)

    # Tiny weights: load once, stay resident for the whole batch tile.
    w_ih1 = w_ih1_ref[...]
    b1 = b1_ref[...]
    w_rec = w_rec_ref[...]
    # Hoisted broadcast (JAX does not CSE broadcast_in_dim inside loops).
    b2 = jnp.broadcast_to(b2_ref[...], (Bt, H4))

    def cell(gates, c_prev):
        # g-gate columns were pre-scaled by 2 in prepare_params(), so one
        # full-width sigmoid covers all four gates: tanh(z) = 2*sigmoid(2z)-1.
        sg = jax.nn.sigmoid(gates)
        i = sg[:, 0:H]
        f = sg[:, H:2 * H]
        g = 2.0 * sg[:, 2 * H:3 * H] - 1.0
        o = sg[:, 3 * H:4 * H]
        c = f * c_prev + i * g
        return o * jnp.tanh(c), c

    def project_chunk(t0, tcur):
        # Hoisted layer-1 input projection for time steps [t0, t0+tcur):
        # one batched (tcur*Bt, C) @ (C, 4H) MXU matmul, b1=b_ih1+b_hh1 folded.
        xc = x_ref[t0:t0 + tcur]                              # (tcur, Bt, C)
        g = jnp.dot(xc.reshape(tcur * Bt, C), w_ih1,
                    preferred_element_type=jnp.float32) + b1
        gates1_ref[0:tcur] = g.reshape(tcur, Bt, H4)

    def slot(s, carry):
        # Skewed recurrence: this iteration does layer-1 step (t0+s) AND
        # layer-2 step (t0+s-1).  Both depend only on last-iteration state and
        # share one (Bt,2H)@(2H,8H) matmul:
        #   cols [0:4H)  = h1_{t-1} @ w_hh1
        #   cols [4H:8H) = h1_{t-1} @ w_ih2 + h2_{t-2} @ w_hh2
        h1, c1, h2, c2 = carry
        rec = jnp.dot(jnp.concatenate([h1, h2], axis=1), w_rec,
                      preferred_element_type=jnp.float32)
        h1n, c1n = cell(rec[:, :H4] + gates1_ref[s], c1)
        h2n, c2n = cell(rec[:, H4:] + b2, c2)
        return h1n, c1n, h2n, c2n

    zeros = jnp.zeros((Bt, H), jnp.float32)
    carry = (zeros, zeros, zeros, zeros)

    for ci in range(n_chunks):           # static chunk loop (bounds VMEM use)
        t0 = ci * Tc
        tcur = min(Tc, T - t0)
        project_chunk(t0, tcur)
        lo = 0
        if ci == 0:
            # Prologue: layer-1 step 0 only (layer-2 has no input yet).
            h1, c1 = cell(gates1_ref[0], zeros)
            carry = (h1, c1, zeros, zeros)
            lo = 1
        carry = lax.fori_loop(lo, tcur, slot, carry,
                              unroll=True if tcur <= 16 else 8)

    # Epilogue: layer-2 step T-1 (consumes h1_{T-1}); layer-1 half of the
    # fused matmul is discarded.
    h1, c1, h2, c2 = carry
    rec = jnp.dot(jnp.concatenate([h1, h2], axis=1), w_rec,
                  preferred_element_type=jnp.float32)
    h2, _ = cell(rec[:, H4:] + b2, c2)

    # Head: fc2(relu(fc1(lstm_out[:, -1, :]))).
    hidden = jnp.maximum(
        jnp.dot(h2, w_fc1_ref[...], preferred_element_type=jnp.float32)
        + b_fc1_ref[...], 0.0)
    o_ref[...] = (jnp.dot(hidden, w_fc2_ref[...],
                          preferred_element_type=jnp.float32)
                  + b_fc2_ref[...])


def prepare_params(params):
    """One-time weight prep outside the hot path:
       * transpose to (K, 4H) layouts, fold b_ih + b_hh,
       * pre-scale the g-gate column block [2H:3H) by 2 so tanh(z) can be
         computed in-kernel as 2*sigmoid(2z)-1 (one sigmoid per gate block),
       * stack [[w_hh1, w_ih2],[0, w_hh2]] into a (2H, 8H) recurrent weight so
         the fused/skewed recurrence is a single MXU matmul per step."""
    H = params["w_hh1"].shape[1]

    def scale_g(wT):
        return wT.at[..., 2 * H:3 * H].multiply(2.0)

    w_ih1 = scale_g(params["w_ih1"].T)                            # (C, 4H)
    w_hh1 = scale_g(params["w_hh1"].T)                            # (H, 4H)
    b1 = scale_g((params["b_ih1"] + params["b_hh1"])[None, :])    # (1, 4H)
    w_ih2 = scale_g(params["w_ih2"].T)                            # (H, 4H)
    w_hh2 = scale_g(params["w_hh2"].T)                            # (H, 4H)
    b2 = scale_g((params["b_ih2"] + params["b_hh2"])[None, :])    # (1, 4H)

    zeros = jnp.zeros_like(w_hh2)
    w_rec = jnp.concatenate(
        [jnp.concatenate([w_hh1, zeros], axis=0),    # -> layer-1 gate columns
         jnp.concatenate([w_ih2, w_hh2], axis=0)],   # -> layer-2 gate columns
        axis=1)                                      # (2H, 8H)

    return dict(
        w_ih1=w_ih1, b1=b1, w_rec=w_rec, b2=b2,
        w_fc1=params["w_fc1"].T, b_fc1=params["b_fc1"][None, :],  # (H, FC1)
        w_fc2=params["w_fc2"].T, b_fc2=params["b_fc2"][None, :],  # (FC1, NCLS)
    )


@jax.jit
def eeg_lstm_forward(x, prep):
    """x: (B, C, T) float32 — same layout the PyTorch module receives."""
    x = x.astype(jnp.float32)
    B, C, T = x.shape
    H = prep["w_rec"].shape[1] // 8
    H4 = 4 * H
    FC1 = prep["w_fc1"].shape[1]
    NCLS = prep["w_fc2"].shape[1]

    b_tile, B_pad = _pick_batch_tiling(B)
    Tc = min(T, TIME_CHUNK)

    # (B, C, T) -> (T, B, C): time leading so per-step data is reached via
    # cheap leading-axis indexing; batch on sublanes, channels on lanes.
    x_tbc = jnp.transpose(x, (2, 0, 1))
    if B_pad != B:
        x_tbc = jnp.pad(x_tbc, ((0, 0), (0, B_pad - B), (0, 0)))

    grid = (B_pad // b_tile,)

    def resident(shape):            # tiny weights: whole-array, VMEM-resident
        return pl.BlockSpec(shape, lambda i: (0,) * len(shape))

    out = pl.pallas_call(
        eeg_lstm_kernel,
        out_shape=jax.ShapeDtypeStruct((B_pad, NCLS), jnp.float32),
        grid_spec=pltpu.PrefetchScalarGridSpec(
            num_scalar_prefetch=0,
            grid=grid,
            in_specs=[
                pl.BlockSpec((T, b_tile, C), lambda i: (0, i, 0)),
                resident((C, H4)), resident((1, H4)),
                resident((2 * H, 8 * H)), resident((1, H4)),
                resident((H, FC1)), resident((1, FC1)),
                resident((FC1, NCLS)), resident((1, NCLS)),
            ],
            out_specs=pl.BlockSpec((b_tile, NCLS), lambda i: (i, 0)),
            scratch_shapes=[
                pltpu.VMEM((Tc, b_tile, H4), jnp.float32),   # layer-1 gates
            ]),
        compiler_params=pltpu.CompilerParams(
            dimension_semantics=("parallel",)),
    )(x_tbc,
      prep["w_ih1"], prep["b1"], prep["w_rec"], prep["b2"],
      prep["w_fc1"], prep["b_fc1"], prep["w_fc2"], prep["b_fc2"])
    return out[:B]


def init_params(key, input_size, hidden_size, fc1_size, num_classes):
    """Deterministic uniform(-k, k) init (same scheme PyTorch uses)."""
    k = 1.0 / jnp.sqrt(hidden_size)
    names_shapes = [
        ("w_ih1", (4 * hidden_size, input_size)),
        ("w_hh1", (4 * hidden_size, hidden_size)),
        ("b_ih1", (4 * hidden_size,)),
        ("b_hh1", (4 * hidden_size,)),
        ("w_ih2", (4 * hidden_size, hidden_size)),
        ("w_hh2", (4 * hidden_size, hidden_size)),
        ("b_ih2", (4 * hidden_size,)),
        ("b_hh2", (4 * hidden_size,)),
        ("w_fc1", (fc1_size, hidden_size)),
        ("b_fc1", (fc1_size,)),
        ("w_fc2", (num_classes, fc1_size)),
        ("b_fc2", (num_classes,)),
    ]
    params = {}
    keys = jax.random.split(key, len(names_shapes))
    for kk, (name, shape) in zip(keys, names_shapes):
        params[name] = jax.random.uniform(kk, shape, jnp.float32, -k, k)
    return params


def reference_forward(x, p):
    """Pure-JAX reference matching torch.nn.LSTM(2 layers) + fc head."""
    hp = jax.lax.Precision.HIGHEST
    x = jnp.transpose(x, (0, 2, 1))  # (B, T, C)
    B, T, _ = x.shape
    H = p["w_hh1"].shape[1]

    def cell(x_t, h, c, w_ih, w_hh, b_ih, b_hh):
        g = (jnp.dot(x_t, w_ih.T, precision=hp) + b_ih
             + jnp.dot(h, w_hh.T, precision=hp) + b_hh)
        i = jax.nn.sigmoid(g[:, :H])
        f = jax.nn.sigmoid(g[:, H:2 * H])
        gg = jnp.tanh(g[:, 2 * H:3 * H])
        o = jax.nn.sigmoid(g[:, 3 * H:])
        c = f * c + i * gg
        return o * jnp.tanh(c), c

    h1 = c1 = h2 = c2 = jnp.zeros((B, H), jnp.float32)
    for t in range(T):
        h1, c1 = cell(x[:, t, :], h1, c1,
                      p["w_ih1"], p["w_hh1"], p["b_ih1"], p["b_hh1"])
        h2, c2 = cell(h1, h2, c2,
                      p["w_ih2"], p["w_hh2"], p["b_ih2"], p["b_hh2"])
    hid = jnp.maximum(jnp.dot(h2, p["w_fc1"].T, precision=hp) + p["b_fc1"], 0.0)
    return jnp.dot(hid, p["w_fc2"].T, precision=hp) + p["b_fc2"]


if __name__ == "__main__":
    key = jax.random.PRNGKey(0)
    kx1, kp1, kx2, kp2 = jax.random.split(key, 4)

    # Small shapes consistent with EEGLSTM(input_size=22, hidden_size, 2, 4).
    B, C, T = 2, 22, 8           # batch, EEG channels (input_size), time steps
    H, FC1, NCLS = 32, 64, 4     # hidden_size, fc1 width, num_classes

    x = jax.random.normal(kx1, (B, C, T), jnp.float32)   # PyTorch-style (B,C,T)
    params = init_params(kp1, C, H, FC1, NCLS)
    prep = prepare_params(params)

    out = jax.block_until_ready(eeg_lstm_forward(x, prep))
    ref = reference_forward(x, params)
    assert out.shape == (B, NCLS)
    assert jnp.allclose(out, ref, atol=2e-3, rtol=2e-3), (out, ref)

    # Second check: exercises multi-chunk time loop (T > TIME_CHUNK), partial
    # unroll, padded batch and a multi-block "parallel" grid.
    B2, T2 = 12, 48
    x2 = jax.random.normal(kx2, (B2, C, T2), jnp.float32)
    params2 = init_params(kp2, C, H, FC1, NCLS)
    prep2 = prepare_params(params2)
    out2 = jax.block_until_ready(eeg_lstm_forward(x2, prep2))
    ref2 = reference_forward(x2, params2)
    assert out2.shape == (B2, NCLS)
    assert jnp.allclose(out2, ref2, atol=2e-3, rtol=2e-3), (out2, ref2)

    print("KERNEL_OK")
</pallas_src>

<mosaic_0001>
module attributes {stable_mosaic.version = 11 : i64} {
  func.func @eeg_lstm_kernel(%arg0: i32, %arg1: memref<8x8x22xf32, #tpu.memory_space<vmem>>, %arg2: memref<22x128xf32, #tpu.memory_space<vmem>>, %arg3: memref<1x128xf32, #tpu.memory_space<vmem>>, %arg4: memref<64x256xf32, #tpu.memory_space<vmem>>, %arg5: memref<1x128xf32, #tpu.memory_space<vmem>>, %arg6: memref<32x64xf32, #tpu.memory_space<vmem>>, %arg7: memref<1x64xf32, #tpu.memory_space<vmem>>, %arg8: memref<64x4xf32, #tpu.memory_space<vmem>>, %arg9: memref<1x4xf32, #tpu.memory_space<vmem>>, %arg10: memref<8x4xf32, #tpu.memory_space<vmem>>, %arg11: memref<8x8x128xf32, #tpu.memory_space<vmem>>) attributes {dimension_semantics = [#tpu.dimension_semantics<parallel>], iteration_bounds = array<i64: 1>, scalar_prefetch = 0 : i64, scratch_operands = 1 : i64, tpu.core_type = #tpu.core_type<tc>, window_params = [{transform_indices = @transform_0, window_bounds = array<i64: 8, 8, 22>}, {pipeline_mode = #tpu.pipeline_mode<synchronous>, transform_indices = @transform_1, window_bounds = array<i64: 22, 128>}, {pipeline_mode = #tpu.pipeline_mode<synchronous>, transform_indices = @transform_2, window_bounds = array<i64: 1, 128>}, {pipeline_mode = #tpu.pipeline_mode<synchronous>, transform_indices = @transform_3, window_bounds = array<i64: 64, 256>}, {pipeline_mode = #tpu.pipeline_mode<synchronous>, transform_indices = @transform_4, window_bounds = array<i64: 1, 128>}, {pipeline_mode = #tpu.pipeline_mode<synchronous>, transform_indices = @transform_5, window_bounds = array<i64: 32, 64>}, {pipeline_mode = #tpu.pipeline_mode<synchronous>, transform_indices = @transform_6, window_bounds = array<i64: 1, 64>}, {pipeline_mode = #tpu.pipeline_mode<synchronous>, transform_indices = @transform_7, window_bounds = array<i64: 64, 4>}, {pipeline_mode = #tpu.pipeline_mode<synchronous>, transform_indices = @transform_8, window_bounds = array<i64: 1, 4>}, {transform_indices = @transform_9, window_bounds = array<i64: 8, 4>}]} {
    %c0 = arith.constant 0 : index
    %c0_0 = arith.constant 0 : index
    %0 = vector.load %arg2[%c0, %c0_0] : memref<22x128xf32, #tpu.memory_space<vmem>>, vector<22x128xf32>
    %c0_1 = arith.constant 0 : index
    %c0_2 = arith.constant 0 : index
    %1 = vector.load %arg3[%c0_1, %c0_2] : memref<1x128xf32, #tpu.memory_space<vmem>>, vector<1x128xf32>
    %c0_3 = arith.constant 0 : index
    %c0_4 = arith.constant 0 : index
    %2 = vector.load %arg4[%c0_3, %c0_4] : memref<64x256xf32, #tpu.memory_space<vmem>>, vector<64x256xf32>
    %c0_5 = arith.constant 0 : index
    %c0_6 = arith.constant 0 : index
    %3 = vector.load %arg5[%c0_5, %c0_6] : memref<1x128xf32, #tpu.memory_space<vmem>>, vector<1x128xf32>
    %4 = vector.shape_cast %3 : vector<1x128xf32> to vector<1x128xf32>
    %5 = vector.broadcast %4 : vector<1x128xf32> to vector<8x128xf32>
    %cst = arith.constant 0.000000e+00 : f32
    %6 = vector.broadcast %cst : f32 to vector<8x32xf32>
    %c0_7 = arith.constant 0 : index
    %c0_8 = arith.constant 0 : index
    %c0_9 = arith.constant 0 : index
    %7 = vector.load %arg1[%c0_7, %c0_8, %c0_9] : memref<8x8x22xf32, #tpu.memory_space<vmem>>, vector<8x8x22xf32>
    %8 = vector.shape_cast %7 : vector<8x8x22xf32> to vector<64x22xf32>
    %cst_10 = arith.constant dense<0.000000e+00> : vector<64x128xf32>
    %9 = tpu.matmul %8, %0, %cst_10 {dimension_numbers = #tpu.dot_dimension_numbers<[1], [0], [0], [1], [0, 0, 1, 1], [], []>} : vector<64x22xf32>, vector<22x128xf32>, vector<64x128xf32> -> vector<64x128xf32>
    %10 = vector.broadcast %1 : vector<1x128xf32> to vector<64x128xf32>
    %11 = arith.addf %9, %10 : vector<64x128xf32>
    %12 = vector.shape_cast %11 : vector<64x128xf32> to vector<8x8x128xf32>
    %c0_11 = arith.constant 0 : index
    %c0_12 = arith.constant 0 : index
    %c0_13 = arith.constant 0 : index
    %13 = vector.load %arg11[%c0_11, %c0_12, %c0_13] : memref<8x8x128xf32, #tpu.memory_space<vmem>>, vector<8x8x128xf32>
    tpu.vector_store %arg11[%c0_11, %c0_12, %c0_13], %12 {strides = array<i32>} : memref<8x8x128xf32, #tpu.memory_space<vmem>>, vector<8x8x128xf32>,
    %c0_14 = arith.constant 0 : index
    %c0_15 = arith.constant 0 : index
    %c0_16 = arith.constant 0 : index
    %14 = vector.load %arg11[%c0_14, %c0_15, %c0_16] : memref<8x8x128xf32, #tpu.memory_space<vmem>>, vector<1x8x128xf32>
    %15 = vector.shape_cast %14 : vector<1x8x128xf32> to vector<8x128xf32>
    %16 = arith.negf %15 : vector<8x128xf32>
    %17 = math.exp %16 : vector<8x128xf32>
    %cst_17 = arith.constant 1.000000e+00 : f32
    %18 = vector.broadcast %cst_17 : f32 to vector<8x128xf32>
    %19 = arith.addf %18, %17 : vector<8x128xf32>
    %20 = arith.divf %18, %19 : vector<8x128xf32>
    %21 = vector.extract_strided_slice %20 {offsets = [0, 0], sizes = [8, 32], strides = [1, 1]} : vector<8x128xf32> to vector<8x32xf32>
    %22 = vector.extract_strided_slice %20 {offsets = [0, 32], sizes = [8, 32], strides = [1, 1]} : vector<8x128xf32> to vector<8x32xf32>
    %23 = vector.extract_strided_slice %20 {offsets = [0, 64], sizes = [8, 32], strides = [1, 1]} : vector<8x128xf32> to vector<8x32xf32>
    %cst_18 = arith.constant 2.000000e+00 : f32
    %24 = vector.broadcast %cst_18 : f32 to vector<8x32xf32>
    %25 = arith.mulf %24, %23 : vector<8x32xf32>
    %cst_19 = arith.constant 1.000000e+00 : f32
    %26 = vector.broadcast %cst_19 : f32 to vector<8x32xf32>
    %27 = arith.subf %25, %26 : vector<8x32xf32>
    %28 = vector.extract_strided_slice %20 {offsets = [0, 96], sizes = [8, 32], strides = [1, 1]} : vector<8x128xf32> to vector<8x32xf32>
    %29 = arith.mulf %22, %6 : vector<8x32xf32>
    %30 = arith.mulf %21, %27 : vector<8x32xf32>
    %31 = arith.addf %29, %30 : vector<8x32xf32>
    %32 = math.tanh %31 : vector<8x32xf32>
    %33 = arith.mulf %28, %32 : vector<8x32xf32>
    %c1_i32 = arith.constant 1 : i32
    %34 = tpu.concatenate %33, %6 in 1 : vector<8x32xf32>, vector<8x32xf32> -> vector<8x64xf32>
    %cst_20 = arith.constant dense<0.000000e+00> : vector<8x256xf32>
    %35 = tpu.matmul %34, %2, %cst_20 {dimension_numbers = #tpu.dot_dimension_numbers<[1], [0], [0], [1], [0, 0, 1, 1], [], []>} : vector<8x64xf32>, vector<64x256xf32>, vector<8x256xf32> -> vector<8x256xf32>
    %36 = vector.extract_strided_slice %35 {offsets = [0, 0], sizes = [8, 128], strides = [1, 1]} : vector<8x256xf32> to vector<8x128xf32>
    %37 = arith.index_cast %c1_i32 : i32 to index
    %c0_21 = arith.constant 0 : index
    %c0_22 = arith.constant 0 : index
    %38 = vector.load %arg11[%37, %c0_21, %c0_22] : memref<8x8x128xf32, #tpu.memory_space<vmem>>, vector<1x8x128xf32>
    %39 = vector.shape_cast %38 : vector<1x8x128xf32> to vector<8x128xf32>
    %40 = arith.addf %36, %39 : vector<8x128xf32>
    %41 = arith.negf %40 : vector<8x128xf32>
    %42 = math.exp %41 : vector<8x128xf32>
    %cst_23 = arith.constant 1.000000e+00 : f32
    %43 = vector.broadcast %cst_23 : f32 to vector<8x128xf32>
    %44 = arith.addf %43, %42 : vector<8x128xf32>
    %45 = arith.divf %43, %44 : vector<8x128xf32>
    %46 = vector.extract_strided_slice %45 {offsets = [0, 0], sizes = [8, 32], strides = [1, 1]} : vector<8x128xf32> to vector<8x32xf32>
    %47 = vector.extract_strided_slice %45 {offsets = [0, 32], sizes = [8, 32], strides = [1, 1]} : vector<8x128xf32> to vector<8x32xf32>
    %48 = vector.extract_strided_slice %45 {offsets = [0, 64], sizes = [8, 32], strides = [1, 1]} : vector<8x128xf32> to vector<8x32xf32>
    %cst_24 = arith.constant 2.000000e+00 : f32
    %49 = vector.broadcast %cst_24 : f32 to vector<8x32xf32>
    %50 = arith.mulf %49, %48 : vector<8x32xf32>
    %cst_25 = arith.constant 1.000000e+00 : f32
    %51 = vector.broadcast %cst_25 : f32 to vector<8x32xf32>
    %52 = arith.subf %50, %51 : vector<8x32xf32>
    %53 = vector.extract_strided_slice %45 {offsets = [0, 96], sizes = [8, 32], strides = [1, 1]} : vector<8x128xf32> to vector<8x32xf32>
    %54 = arith.mulf %47, %31 : vector<8x32xf32>
    %55 = arith.mulf %46, %52 : vector<8x32xf32>
    %56 = arith.addf %54, %55 : vector<8x32xf32>
    %57 = math.tanh %56 : vector<8x32xf32>
    %58 = arith.mulf %53, %57 : vector<8x32xf32>
    %59 = vector.extract_strided_slice %35 {offsets = [0, 128], sizes = [8, 128], strides = [1, 1]} : vector<8x256xf32> to vector<8x128xf32>
    %60 = arith.addf %59, %5 : vector<8x128xf32>
    %61 = arith.negf %60 : vector<8x128xf32>
    %62 = math.exp %61 : vector<8x128xf32>
    %cst_26 = arith.constant 1.000000e+00 : f32
    %63 = vector.broadcast %cst_26 : f32 to vector<8x128xf32>
    %64 = arith.addf %63, %62 : vector<8x128xf32>
    %65 = arith.divf %63, %64 : vector<8x128xf32>
    %66 = vector.extract_strided_slice %65 {offsets = [0, 0], sizes = [8, 32], strides = [1, 1]} : vector<8x128xf32> to vector<8x32xf32>
    %67 = vector.extract_strided_slice %65 {offsets = [0, 32], sizes = [8, 32], strides = [1, 1]} : vector<8x128xf32> to vector<8x32xf32>
    %68 = vector.extract_strided_slice %65 {offsets = [0, 64], sizes = [8, 32], strides = [1, 1]} : vector<8x128xf32> to vector<8x32xf32>
    %cst_27 = arith.constant 2.000000e+00 : f32
    %69 = vector.broadcast %cst_27 : f32 to vector<8x32xf32>
    %70 = arith.mulf %69, %68 : vector<8x32xf32>
    %cst_28 = arith.constant 1.000000e+00 : f32
    %71 = vector.broadcast %cst_28 : f32 to vector<8x32xf32>
    %72 = arith.subf %70, %71 : vector<8x32xf32>
    %73 = vector.extract_strided_slice %65 {offsets = [0, 96], sizes = [8, 32], strides = [1, 1]} : vector<8x128xf32> to vector<8x32xf32>
    %74 = arith.mulf %67, %6 : vector<8x32xf32>
    %75 = arith.mulf %66, %72 : vector<8x32xf32>
    %76 = arith.addf %74, %75 : vector<8x32xf32>
    %77 = math.tanh %76 : vector<8x32xf32>
    %78 = arith.mulf %73, %77 : vector<8x32xf32>
    %c2_i32 = arith.constant 2 : i32
    %79 = tpu.concatenate %58, %78 in 1 : vector<8x32xf32>, vector<8x32xf32> -> vector<8x64xf32>
    %cst_29 = arith.constant dense<0.000000e+00> : vector<8x256xf32>
    %80 = tpu.matmul %79, %2, %cst_29 {dimension_numbers = #tpu.dot_dimension_numbers<[1], [0], [0], [1], [0, 0, 1, 1], [], []>} : vector<8x64xf32>, vector<64x256xf32>, vector<8x256xf32> -> vector<8x256xf32>
    %81 = vector.extract_strided_slice %80 {offsets = [0, 0], sizes = [8, 128], strides = [1, 1]} : vector<8x256xf32> to vector<8x128xf32>
    %82 = arith.index_cast %c2_i32 : i32 to index
    %c0_30 = arith.constant 0 : index
    %c0_31 = arith.constant 0 : index
    %83 = vector.load %arg11[%82, %c0_30, %c0_31] : memref<8x8x128xf32, #tpu.memory_space<vmem>>, vector<1x8x128xf32>
    %84 = vector.shape_cast %83 : vector<1x8x128xf32> to vector<8x128xf32>
    %85 = arith.addf %81, %84 : vector<8x128xf32>
    %86 = arith.negf %85 : vector<8x128xf32>
    %87 = math.exp %86 : vector<8x128xf32>
    %cst_32 = arith.constant 1.000000e+00 : f32
    %88 = vector.broadcast %cst_32 : f32 to vector<8x128xf32>
    %89 = arith.addf %88, %87 : vector<8x128xf32>
    %90 = arith.divf %88, %89 : vector<8x128xf32>
    %91 = vector.extract_strided_slice %90 {offsets = [0, 0], sizes = [8, 32], strides = [1, 1]} : vector<8x128xf32> to vector<8x32xf32>
    %92 = vector.extract_strided_slice %90 {offsets = [0, 32], sizes = [8, 32], strides = [1, 1]} : vector<8x128xf32> to vector<8x32xf32>
    %93 = vector.extract_strided_slice %90 {offsets = [0, 64], sizes = [8, 32], strides = [1, 1]} : vector<8x128xf32> to vector<8x32xf32>
    %cst_33 = arith.constant 2.000000e+00 : f32
    %94 = vector.broadcast %cst_33 : f32 to vector<8x32xf32>
    %95 = arith.mulf %94, %93 : vector<8x32xf32>
    %cst_34 = arith.constant 1.000000e+00 : f32
    %96 = vector.broadcast %cst_34 : f32 to vector<8x32xf32>
    %97 = arith.subf %95, %96 : vector<8x32xf32>
    %98 = vector.extract_strided_slice %90 {offsets = [0, 96], sizes = [8, 32], strides = [1, 1]} : vector<8x128xf32> to vector<8x32xf32>
    %99 = arith.mulf %92, %56 : vector<8x32xf32>
    %100 = arith.mulf %91, %97 : vector<8x32xf32>
    %101 = arith.addf %99, %100 : vector<8x32xf32>
    %102 = math.tanh %101 : vector<8x32xf32>
    %103 = arith.mulf %98, %102 : vector<8x32xf32>
    %104 = vector.extract_strided_slice %80 {offsets = [0, 128], sizes = [8, 128], strides = [1, 1]} : vector<8x256xf32> to vector<8x128xf32>
    %105 = arith.addf %104, %5 : vector<8x128xf32>
    %106 = arith.negf %105 : vector<8x128xf32>
    %107 = math.exp %106 : vector<8x128xf32>
    %cst_35 = arith.constant 1.000000e+00 : f32
    %108 = vector.broadcast %cst_35 : f32 to vector<8x128xf32>
    %109 = arith.addf %108, %107 : vector<8x128xf32>
    %110 = arith.divf %108, %109 : vector<8x128xf32>
    %111 = vector.extract_strided_slice %110 {offsets = [0, 0], sizes = [8, 32], strides = [1, 1]} : vector<8x128xf32> to vector<8x32xf32>
    %112 = vector.extract_strided_slice %110 {offsets = [0, 32], sizes = [8, 32], strides = [1, 1]} : vector<8x128xf32> to vector<8x32xf32>
    %113 = vector.extract_strided_slice %110 {offsets = [0, 64], sizes = [8, 32], strides = [1, 1]} : vector<8x128xf32> to vector<8x32xf32>
    %cst_36 = arith.constant 2.000000e+00 : f32
    %114 = vector.broadcast %cst_36 : f32 to vector<8x32xf32>
    %115 = arith.mulf %114, %113 : vector<8x32xf32>
    %cst_37 = arith.constant 1.000000e+00 : f32
    %116 = vector.broadcast %cst_37 : f32 to vector<8x32xf32>
    %117 = arith.subf %115, %116 : vector<8x32xf32>
    %118 = vector.extract_strided_slice %110 {offsets = [0, 96], sizes = [8, 32], strides = [1, 1]} : vector<8x128xf32> to vector<8x32xf32>
    %119 = arith.mulf %112, %76 : vector<8x32xf32>
    %120 = arith.mulf %111, %117 : vector<8x32xf32>
    %121 = arith.addf %119, %120 : vector<8x32xf32>
    %122 = math.tanh %121 : vector<8x32xf32>
    %123 = arith.mulf %118, %122 : vector<8x32xf32>
    %c3_i32 = arith.constant 3 : i32
    %124 = tpu.concatenate %103, %123 in 1 : vector<8x32xf32>, vector<8x32xf32> -> vector<8x64xf32>
    %cst_38 = arith.constant dense<0.000000e+00> : vector<8x256xf32>
    %125 = tpu.matmul %124, %2, %cst_38 {dimension_numbers = #tpu.dot_dimension_numbers<[1], [0], [0], [1], [0, 0, 1, 1], [], []>} : vector<8x64xf32>, vector<64x256xf32>, vector<8x256xf32> -> vector<8x256xf32>
    %126 = vector.extract_strided_slice %125 {offsets = [0, 0], sizes = [8, 128], strides = [1, 1]} : vector<8x256xf32> to vector<8x128xf32>
    %127 = arith.index_cast %c3_i32 : i32 to index
    %c0_39 = arith.constant 0 : index
    %c0_40 = arith.constant 0 : index
    %128 = vector.load %arg11[%127, %c0_39, %c0_40] : memref<8x8x128xf32, #tpu.memory_space<vmem>>, vector<1x8x128xf32>
    %129 = vector.shape_cast %128 : vector<1x8x128xf32> to vector<8x128xf32>
    %130 = arith.addf %126, %129 : vector<8x128xf32>
    %131 = arith.negf %130 : vector<8x128xf32>
    %132 = math.exp %131 : vector<8x128xf32>
    %cst_41 = arith.constant 1.000000e+00 : f32
    %133 = vector.broadcast %cst_41 : f32 to vector<8x128xf32>
    %134 = arith.addf %133, %132 : vector<8x128xf32>
    %135 = arith.divf %133, %134 : vector<8x128xf32>
    %136 = vector.extract_strided_slice %135 {offsets = [0, 0], sizes = [8, 32], strides = [1, 1]} : vector<8x128xf32> to vector<8x32xf32>
    %137 = vector.extract_strided_slice %135 {offsets = [0, 32], sizes = [8, 32], strides = [1, 1]} : vector<8x128xf32> to vector<8x32xf32>
    %138 = vector.extract_strided_slice %135 {offsets = [0, 64], sizes = [8, 32], strides = [1, 1]} : vector<8x128xf32> to vector<8x32xf32>
    %cst_42 = arith.constant 2.000000e+00 : f32
    %139 = vector.broadcast %cst_42 : f32 to vector<8x32xf32>
    %140 = arith.mulf %139, %138 : vector<8x32xf32>
    %cst_43 = arith.constant 1.000000e+00 : f32
    %141 = vector.broadcast %cst_43 : f32 to vector<8x32xf32>
    %142 = arith.subf %140, %141 : vector<8x32xf32>
    %143 = vector.extract_strided_slice %135 {offsets = [0, 96], sizes = [8, 32], strides = [1, 1]} : vector<8x128xf32> to vector<8x32xf32>
    %144 = arith.mulf %137, %101 : vector<8x32xf32>
    %145 = arith.mulf %136, %142 : vector<8x32xf32>
    %146 = arith.addf %144, %145 : vector<8x32xf32>
    %147 = math.tanh %146 : vector<8x32xf32>
    %148 = arith.mulf %143, %147 : vector<8x32xf32>
    %149 = vector.extract_strided_slice %125 {offsets = [0, 128], sizes = [8, 128], strides = [1, 1]} : vector<8x256xf32> to vector<8x128xf32>
    %150 = arith.addf %149, %5 : vector<8x128xf32>
    %151 = arith.negf %150 : vector<8x128xf32>
    %152 = math.exp %151 : vector<8x128xf32>
    %cst_44 = arith.constant 1.000000e+00 : f32
    %153 = vector.broadcast %cst_44 : f32 to vector<8x128xf32>
    %154 = arith.addf %153, %152 : vector<8x128xf32>
    %155 = arith.divf %153, %154 : vector<8x128xf32>
    %156 = vector.extract_strided_slice %155 {offsets = [0, 0], sizes = [8, 32], strides = [1, 1]} : vector<8x128xf32> to vector<8x32xf32>
    %157 = vector.extract_strided_slice %155 {offsets = [0, 32], sizes = [8, 32], strides = [1, 1]} : vector<8x128xf32> to vector<8x32xf32>
    %158 = vector.extract_strided_slice %155 {offsets = [0, 64], sizes = [8, 32], strides = [1, 1]} : vector<8x128xf32> to vector<8x32xf32>
    %cst_45 = arith.constant 2.000000e+00 : f32
    %159 = vector.broadcast %cst_45 : f32 to vector<8x32xf32>
    %160 = arith.mulf %159, %158 : vector<8x32xf32>
    %cst_46 = arith.constant 1.000000e+00 : f32
    %161 = vector.broadcast %cst_46 : f32 to vector<8x32xf32>
    %162 = arith.subf %160, %161 : vector<8x32xf32>
    %163 = vector.extract_strided_slice %155 {offsets = [0, 96], sizes = [8, 32], strides = [1, 1]} : vector<8x128xf32> to vector<8x32xf32>
    %164 = arith.mulf %157, %121 : vector<8x32xf32>
    %165 = arith.mulf %156, %162 : vector<8x32xf32>
    %166 = arith.addf %164, %165 : vector<8x32xf32>
    %167 = math.tanh %166 : vector<8x32xf32>
    %168 = arith.mulf %163, %167 : vector<8x32xf32>
    %c4_i32 = arith.constant 4 : i32
    %169 = tpu.concatenate %148, %168 in 1 : vector<8x32xf32>, vector<8x32xf32> -> vector<8x64xf32>
    %cst_47 = arith.constant dense<0.000000e+00> : vector<8x256xf32>
    %170 = tpu.matmul %169, %2, %cst_47 {dimension_numbers = #tpu.dot_dimension_numbers<[1], [0], [0], [1], [0, 0, 1, 1], [], []>} : vector<8x64xf32>, vector<64x256xf32>, vector<8x256xf32> -> vector<8x256xf32>
    %171 = vector.extract_strided_slice %170 {offsets = [0, 0], sizes = [8, 128], strides = [1, 1]} : vector<8x256xf32> to vector<8x128xf32>
    %172 = arith.index_cast %c4_i32 : i32 to index
    %c0_48 = arith.constant 0 : index
    %c0_49 = arith.constant 0 : index
    %173 = vector.load %arg11[%172, %c0_48, %c0_49] : memref<8x8x128xf32, #tpu.memory_space<vmem>>, vector<1x8x128xf32>
    %174 = vector.shape_cast %173 : vector<1x8x128xf32> to vector<8x128xf32>
    %175 = arith.addf %171, %174 : vector<8x128xf32>
    %176 = arith.negf %175 : vector<8x128xf32>
    %177 = math.exp %176 : vector<8x128xf32>
    %cst_50 = arith.constant 1.000000e+00 : f32
    %178 = vector.broadcast %cst_50 : f32 to vector<8x128xf32>
    %179 = arith.addf %178, %177 : vector<8x128xf32>
    %180 = arith.divf %178, %179 : vector<8x128xf32>
    %181 = vector.extract_strided_slice %180 {offsets = [0, 0], sizes = [8, 32], strides = [1, 1]} : vector<8x128xf32> to vector<8x32xf32>
    %182 = vector.extract_strided_slice %180 {offsets = [0, 32], sizes = [8, 32], strides = [1, 1]} : vector<8x128xf32> to vector<8x32xf32>
    %183 = vector.extract_strided_slice %180 {offsets = [0, 64], sizes = [8, 32], strides = [1, 1]} : vector<8x128xf32> to vector<8x32xf32>
    %cst_51 = arith.constant 2.000000e+00 : f32
    %184 = vector.broadcast %cst_51 : f32 to vector<8x32xf32>
    %185 = arith.mulf %184, %183 : vector<8x32xf32>
    %cst_52 = arith.constant 1.000000e+00 : f32
    %186 = vector.broadcast %cst_52 : f32 to vector<8x32xf32>
    %187 = arith.subf %185, %186 : vector<8x32xf32>
    %188 = vector.extract_strided_slice %180 {offsets = [0, 96], sizes = [8, 32], strides = [1, 1]} : vector<8x128xf32> to vector<8x32xf32>
    %189 = arith.mulf %182, %146 : vector<8x32xf32>
    %190 = arith.mulf %181, %187 : vector<8x32xf32>
    %191 = arith.addf %189, %190 : vector<8x32xf32>
    %192 = math.tanh %191 : vector<8x32xf32>
    %193 = arith.mulf %188, %192 : vector<8x32xf32>
    %194 = vector.extract_strided_slice %170 {offsets = [0, 128], sizes = [8, 128], strides = [1, 1]} : vector<8x256xf32> to vector<8x128xf32>
    %195 = arith.addf %194, %5 : vector<8x128xf32>
    %196 = arith.negf %195 : vector<8x128xf32>
    %197 = math.exp %196 : vector<8x128xf32>
    %cst_53 = arith.constant 1.000000e+00 : f32
    %198 = vector.broadcast %cst_53 : f32 to vector<8x128xf32>
    %199 = arith.addf %198, %197 : vector<8x128xf32>
    %200 = arith.divf %198, %199 : vector<8x128xf32>
    %201 = vector.extract_strided_slice %200 {offsets = [0, 0], sizes = [8, 32], strides = [1, 1]} : vector<8x128xf32> to vector<8x32xf32>
    %202 = vector.extract_strided_slice %200 {offsets = [0, 32], sizes = [8, 32], strides = [1, 1]} : vector<8x128xf32> to vector<8x32xf32>
    %203 = vector.extract_strided_slice %200 {offsets = [0, 64], sizes = [8, 32], strides = [1, 1]} : vector<8x128xf32> to vector<8x32xf32>
    %cst_54 = arith.constant 2.000000e+00 : f32
    %204 = vector.broadcast %cst_54 : f32 to vector<8x32xf32>
    %205 = arith.mulf %204, %203 : vector<8x32xf32>
    %cst_55 = arith.constant 1.000000e+00 : f32
    %206 = vector.broadcast %cst_55 : f32 to vector<8x32xf32>
    %207 = arith.subf %205, %206 : vector<8x32xf32>
    %208 = vector.extract_strided_slice %200 {offsets = [0, 96], sizes = [8, 32], strides = [1, 1]} : vector<8x128xf32> to vector<8x32xf32>
    %209 = arith.mulf %202, %166 : vector<8x32xf32>
    %210 = arith.mulf %201, %207 : vector<8x32xf32>
    %211 = arith.addf %209, %210 : vector<8x32xf32>
    %212 = math.tanh %211 : vector<8x32xf32>
    %213 = arith.mulf %208, %212 : vector<8x32xf32>
    %c5_i32 = arith.constant 5 : i32
    %214 = tpu.concatenate %193, %213 in 1 : vector<8x32xf32>, vector<8x32xf32> -> vector<8x64xf32>
    %cst_56 = arith.constant dense<0.000000e+00> : vector<8x256xf32>
    %215 = tpu.matmul %214, %2, %cst_56 {dimension_numbers = #tpu.dot_dimension_numbers<[1], [0], [0], [1], [0, 0, 1, 1], [], []>} : vector<8x64xf32>, vector<64x256xf32>, vector<8x256xf32> -> vector<8x256xf32>
    %216 = vector.extract_strided_slice %215 {offsets = [0, 0], sizes = [8, 128], strides = [1, 1]} : vector<8x256xf32> to vector<8x128xf32>
    %217 = arith.index_cast %c5_i32 : i32 to index
    %c0_57 = arith.constant 0 : index
    %c0_58 = arith.constant 0 : index
    %218 = vector.load %arg11[%217, %c0_57, %c0_58] : memref<8x8x128xf32, #tpu.memory_space<vmem>>, vector<1x8x128xf32>
    %219 = vector.shape_cast %218 : vector<1x8x128xf32> to vector<8x128xf32>
    %220 = arith.addf %216, %219 : vector<8x128xf32>
    %221 = arith.negf %220 : vector<8x128xf32>
    %222 = math.exp %221 : vector<8x128xf32>
    %cst_59 = arith.constant 1.000000e+00 : f32
    %223 = vector.broadcast %cst_59 : f32 to vector<8x128xf32>
    %224 = arith.addf %223, %222 : vector<8x128xf32>
    %225 = arith.divf %223, %224 : vector<8x128xf32>
    %226 = vector.extract_strided_slice %225 {offsets = [0, 0], sizes = [8, 32], strides = [1, 1]} : vector<8x128xf32> to vector<8x32xf32>
    %227 = vector.extract_strided_slice %225 {offsets = [0, 32], sizes = [8, 32], strides = [1, 1]} : vector<8x128xf32> to vector<8x32xf32>
    %228 = vector.extract_strided_slice %225 {offsets = [0, 64], sizes = [8, 32], strides = [1, 1]} : vector<8x128xf32> to vector<8x32xf32>
    %cst_60 = arith.constant 2.000000e+00 : f32
    %229 = vector.broadcast %cst_60 : f32 to vector<8x32xf32>
    %230 = arith.mulf %229, %228 : vector<8x32xf32>
    %cst_61 = arith.constant 1.000000e+00 : f32
    %231 = vector.broadcast %cst_61 : f32 to vector<8x32xf32>
    %232 = arith.subf %230, %231 : vector<8x32xf32>
    %233 = vector.extract_strided_slice %225 {offsets = [0, 96], sizes = [8, 32], strides = [1, 1]} : vector<8x128xf32> to vector<8x32xf32>
    %234 = arith.mulf %227, %191 : vector<8x32xf32>
    %235 = arith.mulf %226, %232 : vector<8x32xf32>
    %236 = arith.addf %234, %235 : vector<8x32xf32>
    %237 = math.tanh %236 : vector<8x32xf32>
    %238 = arith.mulf %233, %237 : vector<8x32xf32>
    %239 = vector.extract_strided_slice %215 {offsets = [0, 128], sizes = [8, 128], strides = [1, 1]} : vector<8x256xf32> to vector<8x128xf32>
    %240 = arith.addf %239, %5 : vector<8x128xf32>
    %241 = arith.negf %240 : vector<8x128xf32>
    %242 = math.exp %241 : vector<8x128xf32>
    %cst_62 = arith.constant 1.000000e+00 : f32
    %243 = vector.broadcast %cst_62 : f32 to vector<8x128xf32>
    %244 = arith.addf %243, %242 : vector<8x128xf32>
    %245 = arith.divf %243, %244 : vector<8x128xf32>
    %246 = vector.extract_strided_slice %245 {offsets = [0, 0], sizes = [8, 32], strides = [1, 1]} : vector<8x128xf32> to vector<8x32xf32>
    %247 = vector.extract_strided_slice %245 {offsets = [0, 32], sizes = [8, 32], strides = [1, 1]} : vector<8x128xf32> to vector<8x32xf32>
    %248 = vector.extract_strided_slice %245 {offsets = [0, 64], sizes = [8, 32], strides = [1, 1]} : vector<8x128xf32> to vector<8x32xf32>
    %cst_63 = arith.constant 2.000000e+00 : f32
    %249 = vector.broadcast %cst_63 : f32 to vector<8x32xf32>
    %250 = arith.mulf %249, %248 : vector<8x32xf32>
    %cst_64 = arith.constant 1.000000e+00 : f32
    %251 = vector.broadcast %cst_64 : f32 to vector<8x32xf32>
    %252 = arith.subf %250, %251 : vector<8x32xf32>
    %253 = vector.extract_strided_slice %245 {offsets = [0, 96], sizes = [8, 32], strides = [1, 1]} : vector<8x128xf32> to vector<8x32xf32>
    %254 = arith.mulf %247, %211 : vector<8x32xf32>
    %255 = arith.mulf %246, %252 : vector<8x32xf32>
    %256 = arith.addf %254, %255 : vector<8x32xf32>
    %257 = math.tanh %256 : vector<8x32xf32>
    %258 = arith.mulf %253, %257 : vector<8x32xf32>
    %c6_i32 = arith.constant 6 : i32
    %259 = tpu.concatenate %238, %258 in 1 : vector<8x32xf32>, vector<8x32xf32> -> vector<8x64xf32>
    %cst_65 = arith.constant dense<0.000000e+00> : vector<8x256xf32>
    %260 = tpu.matmul %259, %2, %cst_65 {dimension_numbers = #tpu.dot_dimension_numbers<[1], [0], [0], [1], [0, 0, 1, 1], [], []>} : vector<8x64xf32>, vector<64x256xf32>, vector<8x256xf32> -> vector<8x256xf32>
    %261 = vector.extract_strided_slice %260 {offsets = [0, 0], sizes = [8, 128], strides = [1, 1]} : vector<8x256xf32> to vector<8x128xf32>
    %262 = arith.index_cast %c6_i32 : i32 to index
    %c0_66 = arith.constant 0 : index
    %c0_67 = arith.constant 0 : index
    %263 = vector.load %arg11[%262, %c0_66, %c0_67] : memref<8x8x128xf32, #tpu.memory_space<vmem>>, vector<1x8x128xf32>
    %264 = vector.shape_cast %263 : vector<1x8x128xf32> to vector<8x128xf32>
    %265 = arith.addf %261, %264 : vector<8x128xf32>
    %266 = arith.negf %265 : vector<8x128xf32>
    %267 = math.exp %266 : vector<8x128xf32>
    %cst_68 = arith.constant 1.000000e+00 : f32
    %268 = vector.broadcast %cst_68 : f32 to vector<8x128xf32>
    %269 = arith.addf %268, %267 : vector<8x128xf32>
    %270 = arith.divf %268, %269 : vector<8x128xf32>
    %271 = vector.extract_strided_slice %270 {offsets = [0, 0], sizes = [8, 32], strides = [1, 1]} : vector<8x128xf32> to vector<8x32xf32>
    %272 = vector.extract_strided_slice %270 {offsets = [0, 32], sizes = [8, 32], strides = [1, 1]} : vector<8x128xf32> to vector<8x32xf32>
    %273 = vector.extract_strided_slice %270 {offsets = [0, 64], sizes = [8, 32], strides = [1, 1]} : vector<8x128xf32> to vector<8x32xf32>
    %cst_69 = arith.constant 2.000000e+00 : f32
    %274 = vector.broadcast %cst_69 : f32 to vector<8x32xf32>
    %275 = arith.mulf %274, %273 : vector<8x32xf32>
    %cst_70 = arith.constant 1.000000e+00 : f32
    %276 = vector.broadcast %cst_70 : f32 to vector<8x32xf32>
    %277 = arith.subf %275, %276 : vector<8x32xf32>
    %278 = vector.extract_strided_slice %270 {offsets = [0, 96], sizes = [8, 32], strides = [1, 1]} : vector<8x128xf32> to vector<8x32xf32>
    %279 = arith.mulf %272, %236 : vector<8x32xf32>
    %280 = arith.mulf %271, %277 : vector<8x32xf32>
    %281 = arith.addf %279, %280 : vector<8x32xf32>
    %282 = math.tanh %281 : vector<8x32xf32>
    %283 = arith.mulf %278, %282 : vector<8x32xf32>
    %284 = vector.extract_strided_slice %260 {offsets = [0, 128], sizes = [8, 128], strides = [1, 1]} : vector<8x256xf32> to vector<8x128xf32>
    %285 = arith.addf %284, %5 : vector<8x128xf32>
    %286 = arith.negf %285 : vector<8x128xf32>
    %287 = math.exp %286 : vector<8x128xf32>
    %cst_71 = arith.constant 1.000000e+00 : f32
    %288 = vector.broadcast %cst_71 : f32 to vector<8x128xf32>
    %289 = arith.addf %288, %287 : vector<8x128xf32>
    %290 = arith.divf %288, %289 : vector<8x128xf32>
    %291 = vector.extract_strided_slice %290 {offsets = [0, 0], sizes = [8, 32], strides = [1, 1]} : vector<8x128xf32> to vector<8x32xf32>
    %292 = vector.extract_strided_slice %290 {offsets = [0, 32], sizes = [8, 32], strides = [1, 1]} : vector<8x128xf32> to vector<8x32xf32>
    %293 = vector.extract_strided_slice %290 {offsets = [0, 64], sizes = [8, 32], strides = [1, 1]} : vector<8x128xf32> to vector<8x32xf32>
    %cst_72 = arith.constant 2.000000e+00 : f32
    %294 = vector.broadcast %cst_72 : f32 to vector<8x32xf32>
    %295 = arith.mulf %294, %293 : vector<8x32xf32>
    %cst_73 = arith.constant 1.000000e+00 : f32
    %296 = vector.broadcast %cst_73 : f32 to vector<8x32xf32>
    %297 = arith.subf %295, %296 : vector<8x32xf32>
    %298 = vector.extract_strided_slice %290 {offsets = [0, 96], sizes = [8, 32], strides = [1, 1]} : vector<8x128xf32> to vector<8x32xf32>
    %299 = arith.mulf %292, %256 : vector<8x32xf32>
    %300 = arith.mulf %291, %297 : vector<8x32xf32>
    %301 = arith.addf %299, %300 : vector<8x32xf32>
    %302 = math.tanh %301 : vector<8x32xf32>
    %303 = arith.mulf %298, %302 : vector<8x32xf32>
    %c7_i32 = arith.constant 7 : i32
    %304 = tpu.concatenate %283, %303 in 1 : vector<8x32xf32>, vector<8x32xf32> -> vector<8x64xf32>
    %cst_74 = arith.constant dense<0.000000e+00> : vector<8x256xf32>
    %305 = tpu.matmul %304, %2, %cst_74 {dimension_numbers = #tpu.dot_dimension_numbers<[1], [0], [0], [1], [0, 0, 1, 1], [], []>} : vector<8x64xf32>, vector<64x256xf32>, vector<8x256xf32> -> vector<8x256xf32>
    %306 = vector.extract_strided_slice %305 {offsets = [0, 0], sizes = [8, 128], strides = [1, 1]} : vector<8x256xf32> to vector<8x128xf32>
    %307 = arith.index_cast %c7_i32 : i32 to index
    %c0_75 = arith.constant 0 : index
    %c0_76 = arith.constant 0 : index
    %308 = vector.load %arg11[%307, %c0_75, %c0_76] : memref<8x8x128xf32, #tpu.memory_space<vmem>>, vector<1x8x128xf32>
    %309 = vector.shape_cast %308 : vector<1x8x128xf32> to vector<8x128xf32>
    %310 = arith.addf %306, %309 : vector<8x128xf32>
    %311 = arith.negf %310 : vector<8x128xf32>
    %312 = math.exp %311 : vector<8x128xf32>
    %cst_77 = arith.constant 1.000000e+00 : f32
    %313 = vector.broadcast %cst_77 : f32 to vector<8x128xf32>
    %314 = arith.addf %313, %312 : vector<8x128xf32>
    %315 = arith.divf %313, %314 : vector<8x128xf32>
    %316 = vector.extract_strided_slice %315 {offsets = [0, 0], sizes = [8, 32], strides = [1, 1]} : vector<8x128xf32> to vector<8x32xf32>
    %317 = vector.extract_strided_slice %315 {offsets = [0, 32], sizes = [8, 32], strides = [1, 1]} : vector<8x128xf32> to vector<8x32xf32>
    %318 = vector.extract_strided_slice %315 {offsets = [0, 64], sizes = [8, 32], strides = [1, 1]} : vector<8x128xf32> to vector<8x32xf32>
    %cst_78 = arith.constant 2.000000e+00 : f32
    %319 = vector.broadcast %cst_78 : f32 to vector<8x32xf32>
    %320 = arith.mulf %319, %318 : vector<8x32xf32>
    %cst_79 = arith.constant 1.000000e+00 : f32
    %321 = vector.broadcast %cst_79 : f32 to vector<8x32xf32>
    %322 = arith.subf %320, %321 : vector<8x32xf32>
    %323 = vector.extract_strided_slice %315 {offsets = [0, 96], sizes = [8, 32], strides = [1, 1]} : vector<8x128xf32> to vector<8x32xf32>
    %324 = arith.mulf %317, %281 : vector<8x32xf32>
    %325 = arith.mulf %316, %322 : vector<8x32xf32>
    %326 = arith.addf %324, %325 : vector<8x32xf32>
    %327 = math.tanh %326 : vector<8x32xf32>
    %328 = arith.mulf %323, %327 : vector<8x32xf32>
    %329 = vector.extract_strided_slice %305 {offsets = [0, 128], sizes = [8, 128], strides = [1, 1]} : vector<8x256xf32> to vector<8x128xf32>
    %330 = arith.addf %329, %5 : vector<8x128xf32>
    %331 = arith.negf %330 : vector<8x128xf32>
    %332 = math.exp %331 : vector<8x128xf32>
    %cst_80 = arith.constant 1.000000e+00 : f32
    %333 = vector.broadcast %cst_80 : f32 to vector<8x128xf32>
    %334 = arith.addf %333, %332 : vector<8x128xf32>
    %335 = arith.divf %333, %334 : vector<8x128xf32>
    %336 = vector.extract_strided_slice %335 {offsets = [0, 0], sizes = [8, 32], strides = [1, 1]} : vector<8x128xf32> to vector<8x32xf32>
    %337 = vector.extract_strided_slice %335 {offsets = [0, 32], sizes = [8, 32], strides = [1, 1]} : vector<8x128xf32> to vector<8x32xf32>
    %338 = vector.extract_strided_slice %335 {offsets = [0, 64], sizes = [8, 32], strides = [1, 1]} : vector<8x128xf32> to vector<8x32xf32>
    %cst_81 = arith.constant 2.000000e+00 : f32
    %339 = vector.broadcast %cst_81 : f32 to vector<8x32xf32>
    %340 = arith.mulf %339, %338 : vector<8x32xf32>
    %cst_82 = arith.constant 1.000000e+00 : f32
    %341 = vector.broadcast %cst_82 : f32 to vector<8x32xf32>
    %342 = arith.subf %340, %341 : vector<8x32xf32>
    %343 = vector.extract_strided_slice %335 {offsets = [0, 96], sizes = [8, 32], strides = [1, 1]} : vector<8x128xf32> to vector<8x32xf32>
    %344 = arith.mulf %337, %301 : vector<8x32xf32>
    %345 = arith.mulf %336, %342 : vector<8x32xf32>
    %346 = arith.addf %344, %345 : vector<8x32xf32>
    %347 = math.tanh %346 : vector<8x32xf32>
    %348 = arith.mulf %343, %347 : vector<8x32xf32>
    %c7_i32_83 = arith.constant 7 : i32
    %349 = tpu.concatenate %328, %348 in 1 : vector<8x32xf32>, vector<8x32xf32> -> vector<8x64xf32>
    %cst_84 = arith.constant dense<0.000000e+00> : vector<8x256xf32>
    %350 = tpu.matmul %349, %2, %cst_84 {dimension_numbers = #tpu.dot_dimension_numbers<[1], [0], [0], [1], [0, 0, 1, 1], [], []>} : vector<8x64xf32>, vector<64x256xf32>, vector<8x256xf32> -> vector<8x256xf32>
    %351 = vector.extract_strided_slice %350 {offsets = [0, 128], sizes = [8, 128], strides = [1, 1]} : vector<8x256xf32> to vector<8x128xf32>
    %352 = arith.addf %351, %5 : vector<8x128xf32>
    %353 = arith.negf %352 : vector<8x128xf32>
    %354 = math.exp %353 : vector<8x128xf32>
    %cst_85 = arith.constant 1.000000e+00 : f32
    %355 = vector.broadcast %cst_85 : f32 to vector<8x128xf32>
    %356 = arith.addf %355, %354 : vector<8x128xf32>
    %357 = arith.divf %355, %356 : vector<8x128xf32>
    %358 = vector.extract_strided_slice %357 {offsets = [0, 0], sizes = [8, 32], strides = [1, 1]} : vector<8x128xf32> to vector<8x32xf32>
    %359 = vector.extract_strided_slice %357 {offsets = [0, 32], sizes = [8, 32], strides = [1, 1]} : vector<8x128xf32> to vector<8x32xf32>
    %360 = vector.extract_strided_slice %357 {offsets = [0, 64], sizes = [8, 32], strides = [1, 1]} : vector<8x128xf32> to vector<8x32xf32>
    %cst_86 = arith.constant 2.000000e+00 : f32
    %361 = vector.broadcast %cst_86 : f32 to vector<8x32xf32>
    %362 = arith.mulf %361, %360 : vector<8x32xf32>
    %cst_87 = arith.constant 1.000000e+00 : f32
    %363 = vector.broadcast %cst_87 : f32 to vector<8x32xf32>
    %364 = arith.subf %362, %363 : vector<8x32xf32>
    %365 = vector.extract_strided_slice %357 {offsets = [0, 96], sizes = [8, 32], strides = [1, 1]} : vector<8x128xf32> to vector<8x32xf32>
    %366 = arith.mulf %359, %346 : vector<8x32xf32>
    %367 = arith.mulf %358, %364 : vector<8x32xf32>
    %368 = arith.addf %366, %367 : vector<8x32xf32>
    %369 = math.tanh %368 : vector<8x32xf32>
    %370 = arith.mulf %365, %369 : vector<8x32xf32>
    %c0_88 = arith.constant 0 : index
    %c0_89 = arith.constant 0 : index
    %371 = vector.load %arg6[%c0_88, %c0_89] : memref<32x64xf32, #tpu.memory_space<vmem>>, vector<32x64xf32>
    %cst_90 = arith.constant dense<0.000000e+00> : vector<8x64xf32>
    %372 = tpu.matmul %370, %371, %cst_90 {dimension_numbers = #tpu.dot_dimension_numbers<[1], [0], [0], [1], [0, 0, 1, 1], [], []>} : vector<8x32xf32>, vector<32x64xf32>, vector<8x64xf32> -> vector<8x64xf32>
    %c0_91 = arith.constant 0 : index
    %c0_92 = arith.constant 0 : index
    %373 = vector.load %arg7[%c0_91, %c0_92] : memref<1x64xf32, #tpu.memory_space<vmem>>, vector<1x64xf32>
    %374 = vector.broadcast %373 : vector<1x64xf32> to vector<8x64xf32>
    %375 = arith.addf %372, %374 : vector<8x64xf32>
    %cst_93 = arith.constant 0.000000e+00 : f32
    %376 = vector.broadcast %cst_93 : f32 to vector<8x64xf32>
    %377 = arith.maximumf %375, %376 : vector<8x64xf32>
    %c0_94 = arith.constant 0 : index
    %c0_95 = arith.constant 0 : index
    %378 = vector.load %arg8[%c0_94, %c0_95] : memref<64x4xf32, #tpu.memory_space<vmem>>, vector<64x4xf32>
    %cst_96 = arith.constant dense<0.000000e+00> : vector<8x4xf32>
    %379 = tpu.matmul %377, %378, %cst_96 {dimension_numbers = #tpu.dot_dimension_numbers<[1], [0], [0], [1], [0, 0, 1, 1], [], []>} : vector<8x64xf32>, vector<64x4xf32>, vector<8x4xf32> -> vector<8x4xf32>
    %c0_97 = arith.constant 0 : index
    %c0_98 = arith.constant 0 : index
    %380 = vector.load %arg9[%c0_97, %c0_98] : memref<1x4xf32, #tpu.memory_space<vmem>>, vector<1x4xf32>
    %381 = vector.broadcast %380 : vector<1x4xf32> to vector<8x4xf32>
    %382 = arith.addf %379, %381 : vector<8x4xf32>
    %c0_99 = arith.constant 0 : index
    %c0_100 = arith.constant 0 : index
    %383 = vector.load %arg10[%c0_99, %c0_100] : memref<8x4xf32, #tpu.memory_space<vmem>>, vector<8x4xf32>
    tpu.vector_store %arg10[%c0_99, %c0_100], %382 {strides = array<i32>} : memref<8x4xf32, #tpu.memory_space<vmem>>, vector<8x4xf32>,
    return
  }
  func.func @transform_0(%arg0: i32) -> (i32, i32, i32) {
    %c0_i32 = arith.constant 0 : i32
    %c0_i32_0 = arith.constant 0 : i32
    %c0_i32_1 = arith.constant 0 : i32
    return %c0_i32, %arg0, %c0_i32_0 : i32, i32, i32
  }
  func.func @transform_1(%arg0: i32) -> (i32, i32) {
    %c0_i32 = arith.constant 0 : i32
    %c0_i32_0 = arith.constant 0 : i32
    %c0_i32_1 = arith.constant 0 : i32
    return %c0_i32, %c0_i32_0 : i32, i32
  }
  func.func @transform_2(%arg0: i32) -> (i32, i32) {
    %c0_i32 = arith.constant 0 : i32
    %c0_i32_0 = arith.constant 0 : i32
    %c0_i32_1 = arith.constant 0 : i32
    return %c0_i32, %c0_i32_0 : i32, i32
  }
  func.func @transform_3(%arg0: i32) -> (i32, i32) {
    %c0_i32 = arith.constant 0 : i32
    %c0_i32_0 = arith.constant 0 : i32
    %c0_i32_1 = arith.constant 0 : i32
    return %c0_i32, %c0_i32_0 : i32, i32
  }
  func.func @transform_4(%arg0: i32) -> (i32, i32) {
    %c0_i32 = arith.constant 0 : i32
    %c0_i32_0 = arith.constant 0 : i32
    %c0_i32_1 = arith.constant 0 : i32
    return %c0_i32, %c0_i32_0 : i32, i32
  }
  func.func @transform_5(%arg0: i32) -> (i32, i32) {
    %c0_i32 = arith.constant 0 : i32
    %c0_i32_0 = arith.constant 0 : i32
    %c0_i32_1 = arith.constant 0 : i32
    return %c0_i32, %c0_i32_0 : i32, i32
  }
  func.func @transform_6(%arg0: i32) -> (i32, i32) {
    %c0_i32 = arith.constant 0 : i32
    %c0_i32_0 = arith.constant 0 : i32
    %c0_i32_1 = arith.constant 0 : i32
    return %c0_i32, %c0_i32_0 : i32, i32
  }
  func.func @transform_7(%arg0: i32) -> (i32, i32) {
    %c0_i32 = arith.constant 0 : i32
    %c0_i32_0 = arith.constant 0 : i32
    %c0_i32_1 = arith.constant 0 : i32
    return %c0_i32, %c0_i32_0 : i32, i32
  }
  func.func @transform_8(%arg0: i32) -> (i32, i32) {
    %c0_i32 = arith.constant 0 : i32
    %c0_i32_0 = arith.constant 0 : i32
    %c0_i32_1 = arith.constant 0 : i32
    return %c0_i32, %c0_i32_0 : i32, i32
  }
  func.func @transform_9(%arg0: i32) -> (i32, i32) {
    %c0_i32 = arith.constant 0 : i32
    %c0_i32_0 = arith.constant 0 : i32
    return %arg0, %c0_i32 : i32, i32
  }
}

</mosaic_0001>

<bundles_post_ra>
// kernel: eeg_lstm_forward.1
= control target key start
LH: loop header
LB: loop body
LE: loop exit
PB: predicated region body
PF: predicated region fallthrough
CT: control target
= control target key end

     0   :  { %vm73_vm0 = vcmask 179200   ;;  %vm98_vm1 = vcmask 1045504   ;;  %v1868_v52 = vmov 0.0   ;;  %vm245_vm2 = vcmask 261120   ;;  %s2284_s1 = inlined_call_operand.vmem [shape: f32[22,128], index: 1, kind: input, shape index: {}]   ;;  %s2285_s0 = inlined_call_operand.vmem [shape: f32[8,8,22], index: 0, kind: input, shape index: {}]   ;;  %s2286_s2 = inlined_call_operand.vmem [shape: f32[1,128], index: 2, kind: input, shape index: {}]   ;;  %s2287_s3 = inlined_call_operand.vmem [shape: f32[64,256], index: 3, kind: input, shape index: {}]   ;;  %s2288_s4 = inlined_call_operand.vmem [shape: f32[1,128], index: 4, kind: input, shape index: {}]   ;;  %s2289_s5 = inlined_call_operand.vmem [shape: f32[32,64], index: 5, kind: input, shape index: {}]   ;;  %s2290_s7 = inlined_call_operand.vmem [shape: f32[64,4], index: 7, kind: input, shape index: {}]   ;;  %s2291_s6 = inlined_call_operand.vmem [shape: f32[1,64], index: 6, kind: input, shape index: {}]   ;;  %s2292_s8 = inlined_call_operand.vmem [shape: f32[1,4], index: 8, kind: input, shape index: {}]   ;;  %s2293_s9 = inlined_call_operand.vmem [shape: f32[8,4], index: 9, kind: output, shape index: {}]  }
   0x1   :  { %v32_v0 = vld [vmem:[%s2284_s1] sm:$0xff]  ;;  %v33_v1 = vld [vmem:[%s2284_s1 + $0x8] sm:$0xff]  ;;  %v34_v4 = vld [vmem:[%s2284_s1 + $0x10] sm:$0x3f]  ;;  %s1866_s1 = smov 64   ;;  %452 = vmatprep.mubr.f32.mxu0 %v1868_v52  ;;  %vm247_vm3 = vcmask 523264  }
   0x2   :  { %v1615_v2 = vpack.c.bf16 %v33_v1, %v32_v0  ;;  %v59_v3 = vld [vmem:[%s2285_s0] sm:$0xff]  ;;  %v60_v5 = vld [vmem:[%s2285_s0 + $0x8] sm:$0xff]  ;;  %v61_v21 = vld [vmem:[%s2285_s0 + $0x10] sm:$0xff]  ;;  %vm1870_vm4 = vmmov 0   ;;  %vm1481_vm5 = vcmask 31744  }
   0x3   :  { %1573 = vmatprep.mubr.msk.f32.mxu1 %vm73_vm0, %v59_v3  ;;  %v1941_v6 = vld [vmem:[%s2286_s2] ss:$0 sm:$0xff]  ;;  %s1867_s2 = smov 32   ;;  %v62_v22 = vld [vmem:[%s2285_s0 + $0x18] sm:$0xff]  ;;  %v37_v24 = vld [vmem:[%s2287_s3 + $0x8] sm:$0xff] }
   0x4   :  { %1616 = vmatprep.subr.bf16.mxu1 %v1615_v2  ;;  %v63_v23 = vld [vmem:[%s2285_s0 + $0x20] sm:$0xff]  ;;  %v39_v25 = vld [vmem:[%s2287_s3 + $0x18] sm:$0xff]  ;;  %v38_v28 = vld [vmem:[%s2287_s3 + $0x10] sm:$0xff] }
   0x5   :  { %1618 = vmatpush3.bf16.msra.mxu1 %v1615_v2  ;;  %v36_v26 = vld [vmem:[%s2287_s3] sm:$0xff]  ;;  %v1975_v27 = vpack.c.bf16 %v39_v25, %v37_v24  ;;  %v41_v29 = vld [vmem:[%s2287_s3 + $0x28] sm:$0xff]  ;;  %v43_v30 = vld [vmem:[%s2287_s3 + $0x38] sm:$0xff] }
   0x6   :  { %1571 = vmatprep.subr.msk.mxu1 %vm98_vm1, %v34_v4  ;;  %v1987_v31 = vpack.c.bf16 %v38_v28, %v36_v26  ;;  %v1989_v32 = vpack.c.bf16 %v43_v30, %v41_v29  ;;  %v40_v33 = vld [vmem:[%s2287_s3 + $0x20] sm:$0xff]  ;;  %v42_v34 = vld [vmem:[%s2287_s3 + $0x30] sm:$0xff]  ;;  %v64_v35 = vld [vmem:[%s2285_s0 + $0x28] sm:$0xff] }
   0x7   :  { %v45_v36 = vld [vmem:[%s2287_s3 + $0x48] sm:$0xff]  ;;  %v47_v37 = vld [vmem:[%s2287_s3 + $0x58] sm:$0xff]  ;;  %1636 = vmatprep.subr.bf16.mxu0 %v1975_v27  ;;  %v2010_v38 = vpack.c.bf16 %v42_v34, %v40_v33  ;;  %v65_v39 = vld [vmem:[%s2285_s0 + $0x30] sm:$0xff] }
   0x8   :  { %1638 = vmatpush1.bf16.msra.mxu0 %v1987_v31  ;;  %v2018_v40 = vpack.c.bf16 %v47_v37, %v45_v36  ;;  %v44_v41 = vld [vmem:[%s2287_s3 + $0x40] sm:$0xff]  ;;  %v46_v42 = vld [vmem:[%s2287_s3 + $0x50] sm:$0xff]  ;;  %v66_v43 = vld [vmem:[%s2285_s0 + $0x38] sm:$0xff] }
   0x9   :  { %1572 = vmatpush3.msk.msra.mxu1 %vm98_vm1, %v34_v4  ;;  %v49_v44 = vld [vmem:[%s2287_s3 + $0x68] sm:$0xff]  ;;  %v51_v45 = vld [vmem:[%s2287_s3 + $0x78] sm:$0xff]  ;;  %1640 = vmatprep.subr.bf16.mxu0 %v1989_v32  ;;  %v2038_v46 = vpack.c.bf16 %v46_v42, %v44_v41  ;;  %v48_v49 = vld [vmem:[%s2287_s3 + $0x60] sm:$0xff] }
   0xa   :  { %1574 = vmatmul.mubr.msk.f32.vlgmr.msra.gmra.mrb[0].mxu1 %vm73_vm0, %v60_v5  ;;  %1620 = vmatprep.subr.bf16.mxu1 %v1975_v27  ;;  %v2043_v48 = vpack.c.bf16 %v51_v45, %v49_v44  ;;  %v50_v50 = vld [vmem:[%s2287_s3 + $0x70] sm:$0xff]  ;;  %v2095_v0 = vld [vmem:[%s2288_s4] ss:$0 sm:$0xff] }
   0xb   :  { %1576 = vmatprep.mubr.msk.f32.mxu1 %vm73_vm0, %v61_v21  ;;  %1622 = vmatpush1.bf16.msra.mxu1 %v1987_v31  ;;  %v2054_v51 = vpack.c.bf16 %v50_v50, %v48_v49 }
   0xc   :  { %1624 = vmatprep.subr.bf16.mxu1 %v1989_v32  ;;  %1642 = vmatpush1.bf16.msra.mxu0 %v2010_v38 }
   0xd   :  { %1644 = vmatprep.subr.bf16.mxu0 %v2018_v40 }
   0xe   :  { %1577 = vmatmul.mubr.msk.f32.gmra.mrb[2].mxu1 %vm73_vm0, %v62_v22 }
   0xf   :  { %1579 = vmatprep.mubr.msk.f32.mxu1 %vm73_vm0, %v63_v23  ;;  %1626 = vmatpush1.bf16.msra.mxu1 %v2010_v38 }
  0x10   :  { %1628 = vmatprep.subr.bf16.mxu1 %v2018_v40  ;;  %1646 = vmatpush1.bf16.msra.mxu0 %v2038_v46 }
  0x11   :  { %1648 = vmatprep.subr.bf16.mxu0 %v2043_v48 }
  0x12   :  { %1580 = vmatmul.mubr.msk.f32.gmra.mrb[4].mxu1 %vm73_vm0, %v64_v35 }
  0x13   :  { %1582 = vmatprep.mubr.msk.f32.mxu1 %vm73_vm0, %v65_v39  ;;  %1630 = vmatpush1.bf16.msra.mxu1 %v2038_v46 }
  0x14   :  { %1632 = vmatprep.subr.bf16.mxu1 %v2043_v48  ;;  %1650 = vmatpush1.bf16.msra.mxu0 %v2054_v51 }
  0x15   :  { %1668 = vmatprep.subr.bf16.mxu0 %v1975_v27 }
  0x16   :  { %1583 = vmatmul.mubr.msk.f32.gmra.mrb[6].mxu1 %vm73_vm0, %v66_v43 }
  0x17   :  { %1634 = vmatpush1.bf16.msra.mxu1 %v2054_v51  ;;  %315 = vmatprep.mubr.f32.mxu1 %v1868_v52 }
  0x18   :  { %1652 = vmatprep.subr.bf16.mxu1 %v1975_v27 }
  0xdd   :  { %v1943_v7 = vpop.f32.mrb[0].mxu1 }
  0xde   :  { %v168_v8 = vpop.f32.mrb[1].mxu1  ;;  %v174_v63 = vadd.f32 %v1943_v7, %v1941_v6 }
  0xdf   :  { %v169_v9 = vadd.f32 %v1941_v6, %v168_v8 }
  0xe1   :  { %v1498_v10 = vmul.f32 -1.442695, %v169_v9  ;;  %v2067_v55 = vpop.f32.mrb[2].mxu1 }
  0xe2   :  { %v2069_v56 = vpop.f32.mrb[3].mxu1 }
  0xe3   :  { %1770 = vpow2.f32 %v1498_v10  ;;  %v179_v42 = vadd.f32 %v1941_v6, %v2069_v56 }
  0xe5   :  { %v2071_v57 = vpop.f32.mrb[4].mxu1 }
  0xe6   :  { %v2073_v58 = vpop.f32.mrb[5].mxu1 }
  0xe9   :  { %v2075_v59 = vpop.f32.mrb[6].mxu1 }
  0xea   :  { %v2077_v60 = vpop.f32.mrb[7].mxu1 }
  0xed   :  { %v1771_v11 = vpop.eup %1770 }
  0xee   :  { %v219_v12 = vadd.f32 1.0, %v1771_v11 }
  0xf0   :  { %1772 = vrcp.f32 %v219_v12 }
  0xfa   :  { %v1946_v13 = vpop.eup %1772 }
  0xfb   :  { %v222_v14 = vmul.f32 2.0, %v1946_v13  ;;  %v224_v18 = vmul.f32 0.0, %v1946_v13 }
  0xfd   :  { %v1499_v15 = vadd.f32 -1.0, %v222_v14 }
  0xff   :  { %226 = vrot.lane.b32.xlu0 %v1499_v15, %s1866_s1 }
 0x171   :  { %v227_v16 = vpop.permute.xlu0 %226 }
 0x172   :  { %v229_v17 = vmul.f32 %v1946_v13, %v227_v16 }
 0x174   :  { %231 = vrot.lane.b32.xlu0 %v229_v17, %s1867_s2 }
 0x1e6   :  { %v232_v19 = vpop.permute.xlu0 %231 }
 0x1e7   :  { %v1953_v20 = vadd.f32 %v232_v19, %v224_v18 }
 0x1e9   :  { %1774 = vtanh.f32 %v1953_v20 }
 0x1f3   :  { %v1775_v47 = vpop.eup %1774 }
 0x1f4   :  { %237 = vrot.lane.b32.xlu1 %v1775_v47, %s1866_s1 }
 0x266   :  { %v238_v53 = vpop.permute.xlu1 %237 }
 0x267   :  { %v240_v54 = vmul.f32 %v1946_v13, %v238_v53 }
 0x269   :  { %242 = vrot.lane.b32.xlu1 %v240_v54, %s1867_s2 }
 0x2db   :  { %v243_v61 = vpop.permute.xlu1 %242 }
 0x2dc   :  { %v246_v62 = vsel %vm245_vm2, %v243_v61, 0.0 }
 0x2dd   :  { %1500 = vmatmul.mubr.msk.f32.vlgmr.msra.gmra.mrb[8].mxu1 %vm247_vm3, %v246_v62 }
 0x2de   :  { %1654 = vmatpush1.bf16.msra.mxu1 %v1987_v31  ;;  %589 = vmatprep.mubr.f32.mxu1 %v1868_v52 }
 0x2df   :  { %1656 = vmatprep.subr.bf16.mxu1 %v1989_v32 }
 0x2e2   :  { %1658 = vmatpush1.bf16.msra.mxu1 %v2010_v38 }
 0x2e3   :  { %1660 = vmatprep.subr.bf16.mxu1 %v2018_v40 }
 0x2e6   :  { %1662 = vmatpush1.bf16.msra.mxu1 %v2038_v46 }
 0x2e7   :  { %1664 = vmatprep.subr.bf16.mxu1 %v2043_v48 }
 0x2ea   :  { %1666 = vmatpush1.bf16.msra.mxu1 %v2054_v51 }
 0x2eb   :  { %1684 = vmatprep.subr.bf16.mxu1 %v1975_v27 }
 0x3b0   :  { %v317_v1 = vpop.f32.mrb[8].mxu1 }
 0x3b1   :  { %v324_v2 = vadd.f32 %v317_v1, %v174_v63  ;;  %v319_v3 = vpop.f32.mrb[9].mxu1 }
 0x3b2   :  { %v350_v4 = vadd.f32 %v2095_v0, %v319_v3 }
 0x3b3   :  { %v1501_v5 = vmul.f32 -1.442695, %v324_v2 }
 0x3b4   :  { %v1503_v8 = vmul.f32 -1.442695, %v350_v4 }
 0x3b5   :  { %1776 = vpow2.f32 %v1501_v5 }
 0x3b6   :  { %1778 = vpow2.f32 %v1503_v8 }
 0x3bf   :  { %v1777_v9 = vpop.eup %1776 }
 0x3c0   :  { %v1779_v10 = vpop.eup %1778  ;;  %v328_v11 = vadd.f32 1.0, %v1777_v9 }
 0x3c1   :  { %v354_v12 = vadd.f32 1.0, %v1779_v10 }
 0x3c2   :  { %1780 = vrcp.f32 %v328_v11 }
 0x3c3   :  { %1782 = vrcp.f32 %v354_v12 }
 0x3cc   :  { %v1781_v7 = vpop.eup %1780 }
 0x3cd   :  { %v1783_v13 = vpop.eup %1782  ;;  %v331_v14 = vmul.f32 2.0, %v1781_v7  ;;  %v333_v23 = vmul.f32 %v1781_v7, %v1953_v20 }
 0x3ce   :  { %v357_v15 = vmul.f32 2.0, %v1783_v13  ;;  %v359_v25 = vmul.f32 0.0, %v1783_v13 }
 0x3cf   :  { %v1502_v16 = vadd.f32 -1.0, %v331_v14 }
 0x3d0   :  { %v1504_v17 = vadd.f32 -1.0, %v357_v15 }
 0x3d1   :  { %335 = vrot.lane.b32.xlu0 %v1502_v16, %s1866_s1 }
 0x3d2   :  { %361 = vrot.lane.b32.xlu1 %v1504_v17, %s1866_s1 }
 0x443   :  { %v336_v18 = vpop.permute.xlu0 %335 }
 0x444   :  { %v338_v19 = vmul.f32 %v1781_v7, %v336_v18  ;;  %v362_v21 = vpop.permute.xlu1 %361 }
 0x445   :  { %v364_v22 = vmul.f32 %v1783_v13, %v362_v21 }
 0x446   :  { %340 = vrot.lane.b32.xlu0 %v338_v19, %s1867_s2 }
 0x447   :  { %366 = vrot.lane.b32.xlu1 %v364_v22, %s1867_s2 }
 0x4b8   :  { %v341_v24 = vpop.permute.xlu0 %340 }
 0x4b9   :  { %v343_v26 = vadd.f32 %v341_v24, %v333_v23  ;;  %v367_v28 = vpop.permute.xlu1 %366 }
 0x4ba   :  { %v369_v29 = vadd.f32 %v367_v28, %v359_v25 }
 0x4bb   :  { %1784 = vtanh.f32 %v343_v26 }
 0x4bc   :  { %1786 = vtanh.f32 %v369_v29 }
 0x4c5   :  { %v1785_v30 = vpop.eup %1784 }
 0x4c6   :  { %v1787_v33 = vpop.eup %1786  ;;  %346 = vrot.lane.b32.xlu0 %v1785_v30, %s1866_s1 }
 0x4c7   :  { %372 = vrot.lane.b32.xlu1 %v1787_v33, %s1866_s1 }
 0x538   :  { %v347_v34 = vpop.permute.xlu0 %346 }
 0x539   :  { %v349_v35 = vmul.f32 %v1781_v7, %v347_v34  ;;  %v373_v36 = vpop.permute.xlu1 %372 }
 0x53a   :  { %v375_v37 = vmul.f32 %v1783_v13, %v373_v36 }
 0x53b   :  { %377 = vrot.lane.b32.xlu0 %v349_v35, %s1867_s2 }
 0x53c   :  { %381 = vrot.lane.b32.xlu1 %v375_v37, %s1866_s1 }
 0x5ad   :  { %v378_v20 = vpop.permute.xlu0 %377 }
 0x5ae   :  { %v382_v39 = vpop.permute.xlu1 %381 }
 0x5af   :  { %v384_v41 = vsel %vm245_vm2, %v378_v20, %v382_v39 }
 0x5b0   :  { %1505 = vmatmul.mubr.msk.f32.vlgmr.msra.gmra.mrb[0].mxu0 %vm247_vm3, %v384_v41 }
 0x5b1   :  { %1670 = vmatpush1.bf16.msra.mxu0 %v1987_v31  ;;  %726 = vmatprep.mubr.f32.mxu0 %v1868_v52 }
 0x5b2   :  { %1672 = vmatprep.subr.bf16.mxu0 %v1989_v32 }
 0x5b5   :  { %1674 = vmatpush1.bf16.msra.mxu0 %v2010_v38 }
 0x5b6   :  { %1676 = vmatprep.subr.bf16.mxu0 %v2018_v40 }
 0x5b9   :  { %1678 = vmatpush1.bf16.msra.mxu0 %v2038_v46 }
 0x5ba   :  { %1680 = vmatprep.subr.bf16.mxu0 %v2043_v48 }
 0x5bd   :  { %1682 = vmatpush1.bf16.msra.mxu0 %v2054_v51 }
 0x5be   :  { %1700 = vmatprep.subr.bf16.mxu0 %v1975_v27 }
 0x683   :  { %v454_v43 = vpop.f32.mrb[0].mxu0 }
 0x684   :  { %v461_v44 = vadd.f32 %v454_v43, %v179_v42  ;;  %v456_v45 = vpop.f32.mrb[1].mxu0 }
 0x685   :  { %v487_v47 = vadd.f32 %v2095_v0, %v456_v45 }
 0x686   :  { %v1506_v49 = vmul.f32 -1.442695, %v461_v44 }
 0x687   :  { %v1508_v50 = vmul.f32 -1.442695, %v487_v47 }
 0x688   :  { %1788 = vpow2.f32 %v1506_v49 }
 0x689   :  { %1790 = vpow2.f32 %v1508_v50 }
 0x692   :  { %v1789_v53 = vpop.eup %1788 }
 0x693   :  { %v1791_v54 = vpop.eup %1790  ;;  %v465_v61 = vadd.f32 1.0, %v1789_v53 }
 0x694   :  { %v491_v62 = vadd.f32 1.0, %v1791_v54 }
 0x695   :  { %1792 = vrcp.f32 %v465_v61 }
 0x696   :  { %1794 = vrcp.f32 %v491_v62 }
 0x69f   :  { %v1793_v63 = vpop.eup %1792 }
 0x6a0   :  { %v1795_v1 = vpop.eup %1794  ;;  %v468_v2 = vmul.f32 2.0, %v1793_v63  ;;  %v470_v11 = vmul.f32 %v1793_v63, %v343_v26  ;;  %v184_v26 = vadd.f32 %v2067_v55, %v1941_v6 }
 0x6a1   :  { %v494_v3 = vmul.f32 2.0, %v1795_v1  ;;  %v496_v7 = vmul.f32 %v1795_v1, %v369_v29 }
 0x6a2   :  { %v1507_v56 = vadd.f32 -1.0, %v468_v2 }
 0x6a3   :  { %v1509_v4 = vadd.f32 -1.0, %v494_v3 }
 0x6a4   :  { %472 = vrot.lane.b32.xlu0 %v1507_v56, %s1866_s1 }
 0x6a5   :  { %498 = vrot.lane.b32.xlu1 %v1509_v4, %s1866_s1 }
 0x716   :  { %v473_v5 = vpop.permute.xlu0 %472 }
 0x717   :  { %v475_v8 = vmul.f32 %v1793_v63, %v473_v5  ;;  %v499_v9 = vpop.permute.xlu1 %498 }
 0x718   :  { %v501_v10 = vmul.f32 %v1795_v1, %v499_v9 }
 0x719   :  { %477 = vrot.lane.b32.xlu0 %v475_v8, %s1867_s2 }
 0x71a   :  { %503 = vrot.lane.b32.xlu1 %v501_v10, %s1867_s2 }
 0x78b   :  { %v478_v12 = vpop.permute.xlu0 %477 }
 0x78c   :  { %v480_v13 = vadd.f32 %v478_v12, %v470_v11  ;;  %v504_v14 = vpop.permute.xlu1 %503 }
 0x78d   :  { %v506_v15 = vadd.f32 %v504_v14, %v496_v7  ;;  %v189_v7 = vadd.f32 %v1941_v6, %v2073_v58 }
 0x78e   :  { %1796 = vtanh.f32 %v480_v13 }
 0x78f   :  { %1798 = vtanh.f32 %v506_v15 }
 0x798   :  { %v1797_v16 = vpop.eup %1796 }
 0x799   :  { %v1799_v17 = vpop.eup %1798  ;;  %483 = vrot.lane.b32.xlu0 %v1797_v16, %s1866_s1 }
 0x79a   :  { %509 = vrot.lane.b32.xlu1 %v1799_v17, %s1866_s1 }
 0x80b   :  { %v484_v18 = vpop.permute.xlu0 %483 }
 0x80c   :  { %v486_v19 = vmul.f32 %v1793_v63, %v484_v18  ;;  %v510_v21 = vpop.permute.xlu1 %509 }
 0x80d   :  { %v512_v22 = vmul.f32 %v1795_v1, %v510_v21 }
 0x80e   :  { %514 = vrot.lane.b32.xlu0 %v486_v19, %s1867_s2 }
 0x80f   :  { %518 = vrot.lane.b32.xlu1 %v512_v22, %s1866_s1 }
 0x880   :  { %v515_v23 = vpop.permute.xlu0 %514 }
 0x881   :  { %v519_v24 = vpop.permute.xlu1 %518 }
 0x882   :  { %v521_v25 = vsel %vm245_vm2, %v515_v23, %v519_v24 }
 0x883   :  { %1510 = vmatmul.mubr.msk.f32.vlgmr.msra.gmra.mrb[10].mxu1 %vm247_vm3, %v521_v25 }
 0x884   :  { %1686 = vmatpush1.bf16.msra.mxu1 %v1987_v31  ;;  %863 = vmatprep.mubr.f32.mxu1 %v1868_v52 }
 0x885   :  { %1688 = vmatprep.subr.bf16.mxu1 %v1989_v32 }
 0x888   :  { %1690 = vmatpush1.bf16.msra.mxu1 %v2010_v38 }
 0x889   :  { %1692 = vmatprep.subr.bf16.mxu1 %v2018_v40 }
 0x88c   :  { %1694 = vmatpush1.bf16.msra.mxu1 %v2038_v46 }
 0x88d   :  { %1696 = vmatprep.subr.bf16.mxu1 %v2043_v48 }
 0x890   :  { %1698 = vmatpush1.bf16.msra.mxu1 %v2054_v51 }
 0x891   :  { %1716 = vmatprep.subr.bf16.mxu1 %v1975_v27 }
 0x956   :  { %v591_v28 = vpop.f32.mrb[10].mxu1 }
 0x957   :  { %v598_v29 = vadd.f32 %v591_v28, %v184_v26  ;;  %v593_v30 = vpop.f32.mrb[11].mxu1 }
 0x958   :  { %v624_v33 = vadd.f32 %v2095_v0, %v593_v30 }
 0x959   :  { %v1511_v34 = vmul.f32 -1.442695, %v598_v29 }
 0x95a   :  { %v1513_v35 = vmul.f32 -1.442695, %v624_v33 }
 0x95b   :  { %1800 = vpow2.f32 %v1511_v34 }
 0x95c   :  { %1802 = vpow2.f32 %v1513_v35 }
 0x965   :  { %v1801_v36 = vpop.eup %1800 }
 0x966   :  { %v1803_v37 = vpop.eup %1802  ;;  %v602_v20 = vadd.f32 1.0, %v1801_v36 }
 0x967   :  { %v628_v39 = vadd.f32 1.0, %v1803_v37 }
 0x968   :  { %1804 = vrcp.f32 %v602_v20 }
 0x969   :  { %1806 = vrcp.f32 %v628_v39 }
 0x972   :  { %v1805_v41 = vpop.eup %1804 }
 0x973   :  { %v1807_v42 = vpop.eup %1806  ;;  %v605_v43 = vmul.f32 2.0, %v1805_v41  ;;  %v607_v54 = vmul.f32 %v1805_v41, %v480_v13 }
 0x974   :  { %v631_v44 = vmul.f32 2.0, %v1807_v42  ;;  %v633_v62 = vmul.f32 %v1807_v42, %v506_v15 }
 0x975   :  { %v1512_v55 = vadd.f32 -1.0, %v605_v43 }
 0x976   :  { %v1514_v45 = vadd.f32 -1.0, %v631_v44 }
 0x977   :  { %609 = vrot.lane.b32.xlu0 %v1512_v55, %s1866_s1 }
 0x978   :  { %635 = vrot.lane.b32.xlu1 %v1514_v45, %s1866_s1 }
 0x9e9   :  { %v610_v47 = vpop.permute.xlu0 %609 }
 0x9ea   :  { %v612_v49 = vmul.f32 %v1805_v41, %v610_v47  ;;  %v636_v50 = vpop.permute.xlu1 %635 }
 0x9eb   :  { %v638_v53 = vmul.f32 %v1807_v42, %v636_v50 }
 0x9ec   :  { %614 = vrot.lane.b32.xlu0 %v612_v49, %s1867_s2 }
 0x9ed   :  { %640 = vrot.lane.b32.xlu1 %v638_v53, %s1867_s2 }
 0xa5e   :  { %v615_v61 = vpop.permute.xlu0 %614 }
 0xa5f   :  { %v617_v63 = vadd.f32 %v615_v61, %v607_v54  ;;  %v641_v1 = vpop.permute.xlu1 %640  ;;  %v194_v54 = vadd.f32 %v2071_v57, %v1941_v6 }
 0xa60   :  { %v643_v2 = vadd.f32 %v641_v1, %v633_v62 }
 0xa61   :  { %1808 = vtanh.f32 %v617_v63 }
 0xa62   :  { %1810 = vtanh.f32 %v643_v2 }
 0xa6b   :  { %v1809_v3 = vpop.eup %1808 }
 0xa6c   :  { %v1811_v56 = vpop.eup %1810  ;;  %620 = vrot.lane.b32.xlu0 %v1809_v3, %s1866_s1 }
 0xa6d   :  { %646 = vrot.lane.b32.xlu1 %v1811_v56, %s1866_s1 }
 0xade   :  { %v621_v4 = vpop.permute.xlu0 %620 }
 0xadf   :  { %v623_v5 = vmul.f32 %v1805_v41, %v621_v4  ;;  %v647_v8 = vpop.permute.xlu1 %646 }
 0xae0   :  { %v649_v9 = vmul.f32 %v1807_v42, %v647_v8 }
 0xae1   :  { %651 = vrot.lane.b32.xlu0 %v623_v5, %s1867_s2 }
 0xae2   :  { %655 = vrot.lane.b32.xlu1 %v649_v9, %s1866_s1 }
 0xb53   :  { %v652_v10 = vpop.permute.xlu0 %651 }
 0xb54   :  { %v656_v11 = vpop.permute.xlu1 %655 }
 0xb55   :  { %v658_v12 = vsel %vm245_vm2, %v652_v10, %v656_v11 }
 0xb56   :  { %1515 = vmatmul.mubr.msk.f32.vlgmr.msra.gmra.mrb[2].mxu0 %vm247_vm3, %v658_v12 }
 0xb57   :  { %1702 = vmatpush1.bf16.msra.mxu0 %v1987_v31  ;;  %1000 = vmatprep.mubr.f32.mxu0 %v1868_v52 }
 0xb58   :  { %1704 = vmatprep.subr.bf16.mxu0 %v1989_v32 }
 0xb5b   :  { %1706 = vmatpush1.bf16.msra.mxu0 %v2010_v38 }
 0xb5c   :  { %1708 = vmatprep.subr.bf16.mxu0 %v2018_v40 }
 0xb5f   :  { %1710 = vmatpush1.bf16.msra.mxu0 %v2038_v46 }
 0xb60   :  { %1712 = vmatprep.subr.bf16.mxu0 %v2043_v48 }
 0xb63   :  { %1714 = vmatpush1.bf16.msra.mxu0 %v2054_v51 }
 0xb64   :  { %1732 = vmatprep.subr.bf16.mxu0 %v1975_v27 }
 0xc29   :  { %v728_v13 = vpop.f32.mrb[2].mxu0 }
 0xc2a   :  { %v735_v14 = vadd.f32 %v728_v13, %v189_v7  ;;  %v730_v15 = vpop.f32.mrb[3].mxu0 }
 0xc2b   :  { %v761_v16 = vadd.f32 %v2095_v0, %v730_v15 }
 0xc2c   :  { %v1516_v17 = vmul.f32 -1.442695, %v735_v14 }
 0xc2d   :  { %v1518_v18 = vmul.f32 -1.442695, %v761_v16 }
 0xc2e   :  { %1812 = vpow2.f32 %v1516_v17 }
 0xc2f   :  { %1814 = vpow2.f32 %v1518_v18 }
 0xc38   :  { %v1813_v19 = vpop.eup %1812 }
 0xc39   :  { %v1815_v21 = vpop.eup %1814  ;;  %v739_v22 = vadd.f32 1.0, %v1813_v19 }
 0xc3a   :  { %v765_v23 = vadd.f32 1.0, %v1815_v21 }
 0xc3b   :  { %1816 = vrcp.f32 %v739_v22 }
 0xc3c   :  { %1818 = vrcp.f32 %v765_v23 }
 0xc45   :  { %v1817_v24 = vpop.eup %1816 }
 0xc46   :  { %v1819_v27 = vpop.eup %1818  ;;  %v742_v25 = vmul.f32 2.0, %v1817_v24  ;;  %v744_v35 = vmul.f32 %v1817_v24, %v617_v63 }
 0xc47   :  { %v768_v26 = vmul.f32 2.0, %v1819_v27  ;;  %v770_v37 = vmul.f32 %v1819_v27, %v643_v2 }
 0xc48   :  { %v1517_v58 = vadd.f32 -1.0, %v742_v25 }
 0xc49   :  { %v1519_v28 = vadd.f32 -1.0, %v768_v26 }
 0xc4a   :  { %746 = vrot.lane.b32.xlu0 %v1517_v58, %s1866_s1 }
 0xc4b   :  { %772 = vrot.lane.b32.xlu1 %v1519_v28, %s1866_s1 }
 0xcbc   :  { %v747_v29 = vpop.permute.xlu0 %746 }
 0xcbd   :  { %v749_v30 = vmul.f32 %v1817_v24, %v747_v29  ;;  %v773_v33 = vpop.permute.xlu1 %772 }
 0xcbe   :  { %v775_v34 = vmul.f32 %v1819_v27, %v773_v33 }
 0xcbf   :  { %751 = vrot.lane.b32.xlu0 %v749_v30, %s1867_s2 }
 0xcc0   :  { %777 = vrot.lane.b32.xlu1 %v775_v34, %s1867_s2  ;;  %v199_v34 = vadd.f32 %v1941_v6, %v2077_v60 }
 0xd31   :  { %v752_v36 = vpop.permute.xlu0 %751 }
 0xd32   :  { %v754_v20 = vadd.f32 %v752_v36, %v744_v35  ;;  %v778_v39 = vpop.permute.xlu1 %777 }
 0xd33   :  { %v780_v41 = vadd.f32 %v778_v39, %v770_v37 }
 0xd34   :  { %1820 = vtanh.f32 %v754_v20 }
 0xd35   :  { %1822 = vtanh.f32 %v780_v41 }
 0xd3e   :  { %v1821_v42 = vpop.eup %1820 }
 0xd3f   :  { %v1823_v43 = vpop.eup %1822  ;;  %757 = vrot.lane.b32.xlu0 %v1821_v42, %s1866_s1 }
 0xd40   :  { %783 = vrot.lane.b32.xlu1 %v1823_v43, %s1866_s1 }
 0xdb1   :  { %v758_v44 = vpop.permute.xlu0 %757 }
 0xdb2   :  { %v760_v55 = vmul.f32 %v1817_v24, %v758_v44  ;;  %v784_v45 = vpop.permute.xlu1 %783 }
 0xdb3   :  { %v786_v47 = vmul.f32 %v1819_v27, %v784_v45 }
 0xdb4   :  { %788 = vrot.lane.b32.xlu0 %v760_v55, %s1867_s2 }
 0xdb5   :  { %792 = vrot.lane.b32.xlu1 %v786_v47, %s1866_s1 }
 0xe26   :  { %v789_v49 = vpop.permute.xlu0 %788 }
 0xe27   :  { %v793_v50 = vpop.permute.xlu1 %792 }
 0xe28   :  { %v795_v53 = vsel %vm245_vm2, %v789_v49, %v793_v50 }
 0xe29   :  { %1520 = vmatmul.mubr.msk.f32.vlgmr.msra.gmra.mrb[12].mxu1 %vm247_vm3, %v795_v53 }
 0xe2a   :  { %1718 = vmatpush1.bf16.msra.mxu1 %v1987_v31  ;;  %1137 = vmatprep.mubr.f32.mxu1 %v1868_v52 }
 0xe2b   :  { %1720 = vmatprep.subr.bf16.mxu1 %v1989_v32 }
 0xe2e   :  { %1722 = vmatpush1.bf16.msra.mxu1 %v2010_v38 }
 0xe2f   :  { %1724 = vmatprep.subr.bf16.mxu1 %v2018_v40 }
 0xe32   :  { %1726 = vmatpush1.bf16.msra.mxu1 %v2038_v46 }
 0xe33   :  { %1728 = vmatprep.subr.bf16.mxu1 %v2043_v48 }
 0xe36   :  { %1730 = vmatpush1.bf16.msra.mxu1 %v2054_v51 }
 0xefc   :  { %v865_v61 = vpop.f32.mrb[12].mxu1 }
 0xefd   :  { %v872_v62 = vadd.f32 %v865_v61, %v194_v54  ;;  %v867_v63 = vpop.f32.mrb[13].mxu1 }
 0xefe   :  { %v898_v1 = vadd.f32 %v2095_v0, %v867_v63 }
 0xeff   :  { %v1521_v2 = vmul.f32 -1.442695, %v872_v62 }
 0xf00   :  { %v1523_v3 = vmul.f32 -1.442695, %v898_v1 }
 0xf01   :  { %1824 = vpow2.f32 %v1521_v2 }
 0xf02   :  { %1826 = vpow2.f32 %v1523_v3 }
 0xf0b   :  { %v1825_v56 = vpop.eup %1824 }
 0xf0c   :  { %v1827_v4 = vpop.eup %1826  ;;  %v876_v5 = vadd.f32 1.0, %v1825_v56 }
 0xf0d   :  { %v902_v8 = vadd.f32 1.0, %v1827_v4 }
 0xf0e   :  { %1828 = vrcp.f32 %v876_v5 }
 0xf0f   :  { %1830 = vrcp.f32 %v902_v8 }
 0xf18   :  { %v1829_v9 = vpop.eup %1828 }
 0xf19   :  { %v1831_v10 = vpop.eup %1830  ;;  %v879_v11 = vmul.f32 2.0, %v1829_v9  ;;  %v881_v17 = vmul.f32 %v1829_v9, %v754_v20 }
 0xf1a   :  { %v905_v12 = vmul.f32 2.0, %v1831_v10  ;;  %v907_v19 = vmul.f32 %v1831_v10, %v780_v41 }
 0xf1b   :  { %v1522_v57 = vadd.f32 -1.0, %v879_v11 }
 0xf1c   :  { %v1524_v7 = vadd.f32 -1.0, %v905_v12 }
 0xf1d   :  { %883 = vrot.lane.b32.xlu0 %v1522_v57, %s1866_s1 }
 0xf1e   :  { %909 = vrot.lane.b32.xlu1 %v1524_v7, %s1866_s1 }
 0xf8f   :  { %v884_v13 = vpop.permute.xlu0 %883 }
 0xf90   :  { %v886_v14 = vmul.f32 %v1829_v9, %v884_v13  ;;  %v910_v15 = vpop.permute.xlu1 %909 }
 0xf91   :  { %v912_v16 = vmul.f32 %v1831_v10, %v910_v15 }
 0xf92   :  { %888 = vrot.lane.b32.xlu0 %v886_v14, %s1867_s2 }
 0xf93   :  { %914 = vrot.lane.b32.xlu1 %v912_v16, %s1867_s2 }
0x1004   :  { %v889_v18 = vpop.permute.xlu0 %888 }
0x1005   :  { %v891_v21 = vadd.f32 %v889_v18, %v881_v17  ;;  %v915_v22 = vpop.permute.xlu1 %914 }
0x1006   :  { %v917_v23 = vadd.f32 %v915_v22, %v907_v19 }
0x1007   :  { %1832 = vtanh.f32 %v891_v21 }
0x1008   :  { %1834 = vtanh.f32 %v917_v23 }
0x1011   :  { %v1833_v24 = vpop.eup %1832 }
0x1012   :  { %v1835_v27 = vpop.eup %1834  ;;  %894 = vrot.lane.b32.xlu0 %v1833_v24, %s1866_s1 }
0x1013   :  { %920 = vrot.lane.b32.xlu1 %v1835_v27, %s1866_s1 }
0x1084   :  { %v895_v25 = vpop.permute.xlu0 %894 }
0x1085   :  { %v897_v26 = vmul.f32 %v1829_v9, %v895_v25  ;;  %v921_v58 = vpop.permute.xlu1 %920 }
0x1086   :  { %v923_v28 = vmul.f32 %v1831_v10, %v921_v58  ;;  %v204_v10 = vadd.f32 %v2075_v59, %v1941_v6 }
0x1087   :  { %925 = vrot.lane.b32.xlu0 %v897_v26, %s1867_s2 }
0x1088   :  { %929 = vrot.lane.b32.xlu1 %v923_v28, %s1866_s1 }
0x10f9   :  { %v926_v29 = vpop.permute.xlu0 %925 }
0x10fa   :  { %v930_v30 = vpop.permute.xlu1 %929 }
0x10fb   :  { %v932_v33 = vsel %vm245_vm2, %v926_v29, %v930_v30 }
0x10fc   :  { %1525 = vmatmul.mubr.msk.f32.vlgmr.msra.gmra.mrb[4].mxu0 %vm247_vm3, %v932_v33 }
0x10fd   :  { %1734 = vmatpush1.bf16.msra.mxu0 %v1987_v31  ;;  %1274 = vmatprep.mubr.f32.mxu0 %v1868_v52 }
0x10fe   :  { %1736 = vmatprep.subr.bf16.mxu0 %v1989_v32 }
0x1101   :  { %1738 = vmatpush1.bf16.msra.mxu0 %v2010_v38 }
0x1102   :  { %1740 = vmatprep.subr.bf16.mxu0 %v2018_v40 }
0x1105   :  { %1742 = vmatpush1.bf16.msra.mxu0 %v2038_v46 }
0x1106   :  { %1744 = vmatprep.subr.bf16.mxu0 %v2043_v48 }
0x1109   :  { %1746 = vmatpush1.bf16.msra.mxu0 %v2054_v51 }
0x11cf   :  { %v1002_v35 = vpop.f32.mrb[4].mxu0 }
0x11d0   :  { %v1009_v36 = vadd.f32 %v1002_v35, %v199_v34  ;;  %v1004_v31 = vpop.f32.mrb[5].mxu0 }
0x11d1   :  { %v1035_v37 = vadd.f32 %v2095_v0, %v1004_v31 }
0x11d2   :  { %v1526_v20 = vmul.f32 -1.442695, %v1009_v36 }
0x11d3   :  { %v1528_v32 = vmul.f32 -1.442695, %v1035_v37 }
0x11d4   :  { %1836 = vpow2.f32 %v1526_v20 }
0x11d5   :  { %1838 = vpow2.f32 %v1528_v32 }
0x11de   :  { %v1837_v38 = vpop.eup %1836 }
0x11df   :  { %v1839_v40 = vpop.eup %1838  ;;  %v1013_v39 = vadd.f32 1.0, %v1837_v38 }
0x11e0   :  { %v1039_v46 = vadd.f32 1.0, %v1839_v40 }
0x11e1   :  { %1840 = vrcp.f32 %v1013_v39 }
0x11e2   :  { %1842 = vrcp.f32 %v1039_v46 }
0x11eb   :  { %v1841_v48 = vpop.eup %1840 }
0x11ec   :  { %v1843_v51 = vpop.eup %1842  ;;  %v1016_v41 = vmul.f32 2.0, %v1841_v48  ;;  %v1018_v49 = vmul.f32 %v1841_v48, %v891_v21 }
0x11ed   :  { %v1042_v42 = vmul.f32 2.0, %v1843_v51  ;;  %v1044_v53 = vmul.f32 %v1843_v51, %v917_v23 }
0x11ee   :  { %v1527_v60 = vadd.f32 -1.0, %v1016_v41 }
0x11ef   :  { %v1529_v43 = vadd.f32 -1.0, %v1042_v42 }
0x11f0   :  { %1020 = vrot.lane.b32.xlu0 %v1527_v60, %s1866_s1 }
0x11f1   :  { %1046 = vrot.lane.b32.xlu1 %v1529_v43, %s1866_s1 }
0x1262   :  { %v1021_v44 = vpop.permute.xlu0 %1020 }
0x1263   :  { %v1023_v55 = vmul.f32 %v1841_v48, %v1021_v44  ;;  %v1047_v45 = vpop.permute.xlu1 %1046 }
0x1264   :  { %v1049_v47 = vmul.f32 %v1843_v51, %v1047_v45 }
0x1265   :  { %1025 = vrot.lane.b32.xlu0 %v1023_v55, %s1867_s2 }
0x1266   :  { %1051 = vrot.lane.b32.xlu1 %v1049_v47, %s1867_s2 }
0x12d7   :  { %v1026_v50 = vpop.permute.xlu0 %1025 }
0x12d8   :  { %v1028_v54 = vadd.f32 %v1026_v50, %v1018_v49  ;;  %v1052_v61 = vpop.permute.xlu1 %1051 }
0x12d9   :  { %v1054_v62 = vadd.f32 %v1052_v61, %v1044_v53  ;;  %v1307_v61 = vld [vmem:[%s2289_s5 + $0x8] sm:$0xff] }
0x12da   :  { %1844 = vtanh.f32 %v1028_v54 }
0x12db   :  { %1846 = vtanh.f32 %v1054_v62 }
0x12e4   :  { %v1845_v63 = vpop.eup %1844 }
0x12e5   :  { %v1847_v1 = vpop.eup %1846  ;;  %1031 = vrot.lane.b32.xlu0 %v1845_v63, %s1866_s1 }
0x12e6   :  { %1057 = vrot.lane.b32.xlu1 %v1847_v1, %s1866_s1  ;;  %v1309_v1 = vld [vmem:[%s2289_s5 + $0x18] sm:$0xff] }
0x1357   :  { %v1032_v2 = vpop.permute.xlu0 %1031 }
0x1358   :  { %v1034_v3 = vmul.f32 %v1841_v48, %v1032_v2  ;;  %v1058_v56 = vpop.permute.xlu1 %1057 }
0x1359   :  { %v1060_v4 = vmul.f32 %v1843_v51, %v1058_v56  ;;  %v1393_v56 = vld [vmem:[%s2290_s7] sm:$0xff] }
0x135a   :  { %1062 = vrot.lane.b32.xlu0 %v1034_v3, %s1867_s2 }
0x135b   :  { %1066 = vrot.lane.b32.xlu1 %v1060_v4, %s1866_s1  ;;  %v1394_v4 = vld [vmem:[%s2290_s7 + $0x8] sm:$0xff] }
0x13cc   :  { %v1063_v5 = vpop.permute.xlu0 %1062 }
0x13cd   :  { %v1067_v8 = vpop.permute.xlu1 %1066 }
0x13ce   :  { %v1069_v9 = vsel %vm245_vm2, %v1063_v5, %v1067_v8  ;;  %v1395_v5 = vld [vmem:[%s2290_s7 + $0x10] sm:$0xff]  ;;  %v1396_v8 = vld [vmem:[%s2290_s7 + $0x18] sm:$0xff] }
0x13cf   :  { %1530 = vmatmul.mubr.msk.f32.vlgmr.msra.gmra.mrb[14].mxu1 %vm247_vm3, %v1069_v9  ;;  %v1757_v9 = vpack.c.bf16 %v1396_v8, %v1395_v5 }
0x13d0   :  { %1593 = vmatprep.mubr.msk.f32.mxu1 %vm1870_vm4, %v1868_v52 }
0x14a2   :  { %v1139_v11 = vpop.f32.mrb[14].mxu1 }
0x14a3   :  { %v1146_v12 = vadd.f32 %v1139_v11, %v204_v10  ;;  %v1141_v57 = vpop.f32.mrb[15].mxu1  ;;  %v1397_v10 = vld [vmem:[%s2290_s7 + $0x20] sm:$0xff]  ;;  %v1398_v11 = vld [vmem:[%s2290_s7 + $0x28] sm:$0xff] }
0x14a4   :  { %v1172_v7 = vadd.f32 %v2095_v0, %v1141_v57 }
0x14a5   :  { %v1531_v13 = vmul.f32 -1.442695, %v1146_v12  ;;  %v1760_v12 = vpack.c.bf16 %v1398_v11, %v1397_v10 }
0x14a6   :  { %v1533_v14 = vmul.f32 -1.442695, %v1172_v7 }
0x14a7   :  { %1848 = vpow2.f32 %v1531_v13 }
0x14a8   :  { %1850 = vpow2.f32 %v1533_v14  ;;  %v1399_v14 = vld [vmem:[%s2290_s7 + $0x30] sm:$0xff] }
0x14b1   :  { %v1849_v15 = vpop.eup %1848 }
0x14b2   :  { %v1851_v16 = vpop.eup %1850  ;;  %v1150_v17 = vadd.f32 1.0, %v1849_v15  ;;  %v1400_v15 = vld [vmem:[%s2290_s7 + $0x38] sm:$0xff] }
0x14b3   :  { %v1176_v18 = vadd.f32 1.0, %v1851_v16  ;;  %v1763_v16 = vpack.c.bf16 %v1400_v15, %v1399_v14 }
0x14b4   :  { %1852 = vrcp.f32 %v1150_v17  ;;  %v1538_v17 = vld [vmem:[%s2291_s6] ss:$0 sm:$0xff] }
0x14b5   :  { %1854 = vrcp.f32 %v1176_v18 }
0x14be   :  { %v1853_v19 = vpop.eup %1852 }
0x14bf   :  { %v1855_v21 = vpop.eup %1854  ;;  %v1153_v22 = vmul.f32 2.0, %v1853_v19  ;;  %v1155_v58 = vmul.f32 %v1853_v19, %v1028_v54  ;;  %v1869_v54 = vmov 0.0|0.0  }
0x14c0   :  { %v1179_v23 = vmul.f32 2.0, %v1855_v21  ;;  %v1181_v29 = vmul.f32 %v1855_v21, %v1054_v62  ;;  %1747 = vmatprep.subr.bf16.mxu1 %v1869_v54  ;;  %v1308_v62 = vld [vmem:[%s2289_s5 + $0x10] sm:$0xff]  ;;  %1753 = vmatprep.subr.bf16.mxu0 %v1869_v54 }
0x14c1   :  { %v1532_v6 = vadd.f32 -1.0, %v1153_v22  ;;  %v1751_v2 = vpack.c.bf16 %v1309_v1, %v1308_v62 }
0x14c2   :  { %v1534_v59 = vadd.f32 -1.0, %v1179_v23  ;;  %v1540_v23 = vld [vmem:[%s2292_s8] ss:$0 sm:$0xff] }
0x14c3   :  { %1157 = vrot.lane.b32.xlu0 %v1532_v6, %s1866_s1 }
0x14c4   :  { %1183 = vrot.lane.b32.xlu1 %v1534_v59, %s1866_s1 }
0x1535   :  { %v1158_v24 = vpop.permute.xlu0 %1157 }
0x1536   :  { %v1160_v27 = vmul.f32 %v1853_v19, %v1158_v24  ;;  %v1184_v25 = vpop.permute.xlu1 %1183 }
0x1537   :  { %v1186_v26 = vmul.f32 %v1855_v21, %v1184_v25 }
0x1538   :  { %1162 = vrot.lane.b32.xlu0 %v1160_v27, %s1867_s2 }
0x1539   :  { %1188 = vrot.lane.b32.xlu1 %v1186_v26, %s1867_s2 }
0x15aa   :  { %v1163_v28 = vpop.permute.xlu0 %1162 }
0x15ab   :  { %v1165_v30 = vadd.f32 %v1163_v28, %v1155_v58  ;;  %v1189_v33 = vpop.permute.xlu1 %1188 }
0x15ac   :  { %v1191_v34 = vadd.f32 %v1189_v33, %v1181_v29 }
0x15ad   :  { %1856 = vtanh.f32 %v1165_v30 }
0x15ae   :  { %1858 = vtanh.f32 %v1191_v34 }
0x15b7   :  { %v1857_v35 = vpop.eup %1856 }
0x15b8   :  { %v1859_v36 = vpop.eup %1858  ;;  %1168 = vrot.lane.b32.xlu0 %v1857_v35, %s1866_s1 }
0x15b9   :  { %1194 = vrot.lane.b32.xlu1 %v1859_v36, %s1866_s1 }
0x162a   :  { %v1169_v31 = vpop.permute.xlu0 %1168 }
0x162b   :  { %v1171_v37 = vmul.f32 %v1853_v19, %v1169_v31  ;;  %v1195_v20 = vpop.permute.xlu1 %1194 }
0x162c   :  { %v1197_v32 = vmul.f32 %v1855_v21, %v1195_v20 }
0x162d   :  { %1199 = vrot.lane.b32.xlu0 %v1171_v37, %s1867_s2 }
0x162e   :  { %1203 = vrot.lane.b32.xlu1 %v1197_v32, %s1866_s1 }
0x169f   :  { %v1200_v38 = vpop.permute.xlu0 %1199 }
0x16a0   :  { %v1204_v40 = vpop.permute.xlu1 %1203 }
0x16a1   :  { %v1206_v39 = vsel %vm245_vm2, %v1200_v38, %v1204_v40 }
0x16a2   :  { %1535 = vmatmul.mubr.msk.f32.vlgmr.msra.gmra.mrb[6].mxu0 %vm247_vm3, %v1206_v39 }
0x16a3   :  { %1612 = vmatprep.mubr.msk.f32.mxu0 %vm1870_vm4, %v1868_v52  ;;  %v1754_v52 = vpack.c.bf16 %v1394_v4, %v1393_v56 }
0x16a5   :  { %1755 = vmatpush3.bf16.msra.mxu0 %v1754_v52 }
0x16a6   :  { %1756 = vmatprep.subr.bf16.mxu0 %v1869_v54 }
0x16a9   :  { %1758 = vmatpush3.bf16.msra.mxu0 %v1757_v9 }
0x16aa   :  { %1759 = vmatprep.subr.bf16.mxu0 %v1869_v54 }
0x16ad   :  { %1761 = vmatpush3.bf16.msra.mxu0 %v1760_v12 }
0x16ae   :  { %1762 = vmatprep.subr.bf16.mxu0 %v1869_v54 }
0x16b1   :  { %1764 = vmatpush3.bf16.msra.mxu0 %v1763_v16 }
0x1775   :  { %v1276_v46 = vpop.f32.mrb[6].mxu0 }
0x1776   :  { %v1277_v48 = vpop.f32.mrb[7].mxu0 }
0x1777   :  { %v1280_v51 = vadd.f32 %v2095_v0, %v1277_v48  ;;  %v1306_v0 = vld [vmem:[%s2289_s5] sm:$0xff] }
0x1778   :  { %v1748_v63 = vpack.c.bf16 %v1307_v61, %v1306_v0 }
0x1779   :  { %v1536_v41 = vmul.f32 -1.442695, %v1280_v51 }
0x177a   :  { %1749 = vmatpush3.bf16.msra.mxu1 %v1748_v63 }
0x177b   :  { %1860 = vpow2.f32 %v1536_v41  ;;  %1750 = vmatprep.subr.bf16.mxu1 %v1869_v54 }
0x177e   :  { %1752 = vmatpush3.bf16.msra.mxu1 %v1751_v2 }
0x1785   :  { %v1861_v42 = vpop.eup %1860 }
0x1786   :  { %v1284_v60 = vadd.f32 1.0, %v1861_v42 }
0x1788   :  { %1862 = vrcp.f32 %v1284_v60 }
0x1792   :  { %v1863_v43 = vpop.eup %1862 }
0x1793   :  { %v1287_v44 = vmul.f32 2.0, %v1863_v43  ;;  %v1289_v49 = vmul.f32 %v1863_v43, %v1191_v34 }
0x1795   :  { %v1537_v55 = vadd.f32 -1.0, %v1287_v44 }
0x1797   :  { %1291 = vrot.lane.b32.xlu0 %v1537_v55, %s1866_s1 }
0x1809   :  { %v1292_v45 = vpop.permute.xlu0 %1291 }
0x180a   :  { %v1294_v47 = vmul.f32 %v1863_v43, %v1292_v45 }
0x180c   :  { %1296 = vrot.lane.b32.xlu1 %v1294_v47, %s1867_s2 }
0x187e   :  { %v1297_v50 = vpop.permute.xlu1 %1296 }
0x187f   :  { %v1299_v53 = vadd.f32 %v1297_v50, %v1289_v49 }
0x1881   :  { %1864 = vtanh.f32 %v1299_v53 }
0x188b   :  { %v1865_v3 = vpop.eup %1864 }
0x188c   :  { %1302 = vrot.lane.b32.xlu0 %v1865_v3, %s1866_s1 }
0x18fe   :  { %v1303_v57 = vpop.permute.xlu0 %1302 }
0x18ff   :  { %v1305_v7 = vmul.f32 %v1863_v43, %v1303_v57 }
0x1901   :  { %1318 = vrot.lane.b32.xlu1 %v1305_v7, %s1867_s2 }
0x1973   :  { %v1319_v13 = vpop.permute.xlu1 %1318 }
0x1974   :  { %1594 = vmatmul.mubr.msk.f32.vlgmr.msra.gmra.mrb[16].mxu1 %vm245_vm2, %v1319_v13 }
0x1a47   :  { %v1388_v18 = vpop.f32.mrb[16].mxu1 }
0x1a48   :  { %v1389_v19 = vadd.f32 %v1538_v17, %v1388_v18  ;;  %v1595_v21 = vpop.f32.mrb[17].mxu1 }
0x1a4a   :  { %v1392_v22 = vmax.f32 %v1389_v19, 0.0 }
0x1a4c   :  { %1613 = vmatmul.mubr.msk.f32.vlgmr.msra.gmra.mrb[8].mxu0 %vm247_vm3, %v1392_v22 }
0x1b1f   :  { %v1477_v6 = vpop.f32.mrb[8].mxu0 }
0x1b20   :  { %v1478_v59 = vadd.f32 %v1540_v23, %v1477_v6  ;;  %v1614_v24 = vpop.f32.mrb[9].mxu0 }
0x1b22   :  { %1482 = vst.msk [vmem:[%s2293_s9] sm:$0xff] %vm1481_vm5, %v1478_v59 }

</bundles_post_ra>
